<compile_context>
chip_gen: v5e
topology: v5e:2x2
jax: 0.10.0
libtpu: 0.0.40
codegen_flags: <defaults>
</compile_context>

<pallas_src>
import functools

import numpy as np
import jax
import jax.numpy as jnp
from jax.experimental import pallas as pl
from jax.experimental.pallas import tpu as pltpu


def make_kernel(k):
    """NumPy port of the PyTorch make_kernel (static init-time buffer)."""
    k = np.asarray(k, dtype=np.float32)
    if k.ndim == 1:
        k = k[None, :] * k[:, None]
    k = k / k.sum()
    return k


def _fill_padded(x_ref, pad_ref, pad0, pad1):
    """Zero only the pad border strips, then copy the interior (on-chip)."""
    bb, H, W, bc = x_ref.shape
    _, Hp, Wp, _ = pad_ref.shape
    zdt = pad_ref.dtype
    if pad0 > 0:
        pad_ref[:, 0:pad0, :, :] = jnp.zeros((bb, pad0, Wp, bc), zdt)
    if pad1 > 0:
        pad_ref[:, pad0 + H:Hp, :, :] = jnp.zeros((bb, pad1, Wp, bc), zdt)
    if pad0 > 0:
        pad_ref[:, pad0:pad0 + H, 0:pad0, :] = jnp.zeros((bb, H, pad0, bc), zdt)
    if pad1 > 0:
        pad_ref[:, pad0:pad0 + H, pad0 + W:Wp, :] = jnp.zeros((bb, H, pad1, bc), zdt)
    pad_ref[:, pad0:pad0 + H, pad0:pad0 + W, :] = x_ref[...].astype(zdt)


def _blur_sep_kernel(x_ref, o_ref, pad_ref, tmp_ref, *, h_taps, w_taps, pad0, pad1):
    # Channels-last tiles:
    #   x_ref:   (bb, H,  W,  bc)   input tile
    #   o_ref:   (bb, Ho, Wo, bc)   output tile
    #   pad_ref: (bb, Hp, Wp, bc)   padded input scratch (x.dtype)
    #   tmp_ref: (bb, Hp, Wo, bc)   horizontal-pass scratch (f32)
    bb, H, W, bc = x_ref.shape
    _, Hp, Wp, _ = pad_ref.shape
    _, Ho, Wo, _ = o_ref.shape

    _fill_padded(x_ref, pad_ref, pad0, pad1)

    # Horizontal (W) pass: static tap loop, f32 accumulation, first tap assigns.
    acc = None
    for j, t in enumerate(w_taps):
        if t == 0.0:
            continue
        v = pad_ref[:, :, j:j + Wo, :].astype(jnp.float32) * t
        acc = v if acc is None else acc + v
    tmp_ref[...] = acc if acc is not None else jnp.zeros(tmp_ref.shape, jnp.float32)

    # Vertical (H) pass.
    out = None
    for i, t in enumerate(h_taps):
        if t == 0.0:
            continue
        v = tmp_ref[:, i:i + Ho, :, :] * t
        out = v if out is None else out + v
    if out is None:
        out = jnp.zeros((bb, Ho, Wo, bc), jnp.float32)
    o_ref[...] = out.astype(o_ref.dtype)


def _blur_2d_kernel(x_ref, o_ref, pad_ref, *, taps, pad0, pad1):
    # Fallback for non-separable (2-D) kernel specs. Same layout as above.
    bb, H, W, bc = x_ref.shape
    _, Ho, Wo, _ = o_ref.shape

    _fill_padded(x_ref, pad_ref, pad0, pad1)

    acc = None
    for i, row in enumerate(taps):
        for j, t in enumerate(row):
            if t == 0.0:
                continue
            v = pad_ref[:, i:i + Ho, j:j + Wo, :].astype(jnp.float32) * t
            acc = v if acc is None else acc + v
    if acc is None:
        acc = jnp.zeros((bb, Ho, Wo, bc), jnp.float32)
    o_ref[...] = acc.astype(o_ref.dtype)


def blur_forward(x, blur_k, pad, upsample_factor=1):
    """Pallas implementation of Blur(kernel, pad, upsample_factor)(x).

    x:      (B, C, H, W) float array (NCHW, as in the PyTorch module)
    blur_k: 1-D or 2-D kernel spec (as passed to Blur.__init__), e.g. [1,3,3,1]
    pad:    (pad0, pad1) applied to both H and W (before, after)
    """
    pad0, pad1 = int(pad[0]), int(pad[1])
    # TODO(synk): negative (cropping) pads of generic upfirdn2d are not
    # handled; StyleGAN2's Blur only ever uses non-negative pads.
    assert pad0 >= 0 and pad1 >= 0

    k_np = np.asarray(blur_k, dtype=np.float32)
    separable = (k_np.ndim == 1)
    k2d = make_kernel(blur_k)
    if upsample_factor > 1:
        k2d = k2d * (upsample_factor ** 2)
    kh, kw = k2d.shape

    # F.conv2d(padded, flip(kernel)) == cross-correlation with flipped taps.
    if separable:
        k1 = k_np / k_np.sum()
        if upsample_factor > 1:
            k1 = k1 * float(upsample_factor)
        h_taps = tuple(float(v) for v in k1[::-1])
        w_taps = tuple(float(v) for v in k1[::-1])
    else:
        taps2d = tuple(tuple(float(v) for v in row) for row in k2d[::-1, ::-1])

    B, C, H, W = x.shape
    Hp, Wp = H + pad0 + pad1, W + pad0 + pad1
    Ho, Wo = Hp - kh + 1, Wp - kw + 1
    assert Ho > 0 and Wo > 0

    # Scratch/compute dtype: keep bf16 inputs in bf16 on-chip (halves scratch
    # bytes); accumulation is always f32.
    if x.dtype == jnp.bfloat16 or x.dtype == jnp.float32:
        scratch_dt = x.dtype
    else:
        scratch_dt = jnp.float32
    itemsize = np.dtype(x.dtype).itemsize
    s_item = np.dtype(scratch_dt).itemsize

    # ---- VMEM-budget-aware tile sizing (safe on v5e/v6e/v7x) ----
    BUDGET = 24 * 1024 * 1024          # per-step tile budget
    VMEM_LIMIT = 48 * 1024 * 1024      # scoped VMEM limit (< v7x's 64 MiB)

    def footprint(bb_, bc_):
        inp = 2 * bb_ * H * W * bc_ * itemsize        # double-buffered input
        out = 2 * bb_ * Ho * Wo * bc_ * itemsize      # double-buffered output
        padb = bb_ * Hp * Wp * bc_ * s_item
        tmpb = bb_ * Hp * Wo * bc_ * 4 if separable else 0
        return inp + out + padb + tmpb

    # Lane-dense channel tile: a multiple of 128 when C allows, else full C.
    if C % 128 == 0:
        cands = [c for c in range(C, 0, -128) if C % c == 0]
    else:
        cands = [C]
    bc = cands[-1]
    for c in cands:
        if footprint(1, c) <= BUDGET:
            bc = c
            break
    # TODO(synk): if even the smallest legal bc overflows the budget (very
    # large H*W with C not a multiple of 128) we would also need to tile H.

    # Fold batch into the block while it fits the budget; keep >=2 parallel
    # grid steps so v7x megacore sharding engages.
    bb = 1
    for d in range(B, 0, -1):
        if B % d == 0 and footprint(d, bc) <= BUDGET:
            bb = d
            break
    if (B // bb) * (C // bc) < 2 and B > 1:
        bb = max(d for d in range(1, B) if B % d == 0)

    if separable:
        kern = functools.partial(_blur_sep_kernel, h_taps=h_taps, w_taps=w_taps,
                                 pad0=pad0, pad1=pad1)
        scratch = [pltpu.VMEM((bb, Hp, Wp, bc), scratch_dt),
                   pltpu.VMEM((bb, Hp, Wo, bc), jnp.float32)]
    else:
        kern = functools.partial(_blur_2d_kernel, taps=taps2d, pad0=pad0, pad1=pad1)
        scratch = [pltpu.VMEM((bb, Hp, Wp, bc), scratch_dt)]

    # Channels-last (lane-dense) layout for the kernel; transposed back after.
    # TODO(synk): a v7x-only variant could run the two separable passes as
    # banded matmuls on the MXU; not done here.
    xt = jnp.transpose(x, (0, 2, 3, 1))   # (B, H, W, C)

    out_nhwc = pl.pallas_call(
        kern,
        out_shape=jax.ShapeDtypeStruct((B, Ho, Wo, C), x.dtype),
        grid=(B // bb, C // bc),
        in_specs=[pl.BlockSpec((bb, H, W, bc), lambda b, c: (b, 0, 0, c))],
        out_specs=pl.BlockSpec((bb, Ho, Wo, bc), lambda b, c: (b, 0, 0, c)),
        scratch_shapes=scratch,
        compiler_params=pltpu.CompilerParams(
            dimension_semantics=("parallel", "parallel"),
            vmem_limit_bytes=VMEM_LIMIT),
    )(xt)

    return jnp.transpose(out_nhwc, (0, 3, 1, 2))   # back to NCHW


def blur_reference(x, blur_k, pad, upsample_factor=1):
    """Plain-JAX reference: upfirdn2d(x, make_kernel(blur_k), up=1, down=1)."""
    k2d = make_kernel(blur_k)
    if upsample_factor > 1:
        k2d = k2d * (upsample_factor ** 2)
    pad0, pad1 = int(pad[0]), int(pad[1])
    B, C, H, W = x.shape
    xp = jnp.pad(x, ((0, 0), (0, 0), (pad0, pad1), (pad0, pad1)))
    w = jnp.asarray(np.ascontiguousarray(k2d[::-1, ::-1]), x.dtype)  # flipped
    w = jnp.tile(w[None, None], (C, 1, 1, 1))                        # (C,1,kh,kw)
    return jax.lax.conv_general_dilated(
        xp, w, window_strides=(1, 1), padding="VALID",
        dimension_numbers=("NCHW", "OIHW", "NCHW"),
        feature_group_count=C)


if __name__ == "__main__":
    batch, channel, hw = 2, 4, 16
    blur_k = [1, 3, 3, 1]          # StyleGAN2 default blur kernel
    pad = (2, 1)                   # typical Blur pad for k=4

    key = jax.random.PRNGKey(0)
    x = jax.random.normal(key, (batch, channel, hw, hw), jnp.float32)

    out = blur_forward(x, blur_k, pad)
    out = jax.block_until_ready(out)

    ref = blur_reference(x, blur_k, pad)
    assert out.shape == ref.shape == (batch, channel, hw, hw), (out.shape, ref.shape)
    assert jnp.allclose(out, ref, atol=1e-5, rtol=1e-5), float(jnp.max(jnp.abs(out - ref)))

    print("KERNEL_OK")
</pallas_src>

<mosaic_0001>
module attributes {stable_mosaic.version = 11 : i64} {
  func.func @_blur_sep_kernel(%arg0: i32, %arg1: i32, %arg2: memref<1x16x16x4xf32, #tpu.memory_space<vmem>>, %arg3: memref<1x16x16x4xf32, #tpu.memory_space<vmem>>, %arg4: memref<1x19x19x4xf32, #tpu.memory_space<vmem>>, %arg5: memref<1x19x16x4xf32, #tpu.memory_space<vmem>>) attributes {dimension_semantics = [#tpu.dimension_semantics<parallel>, #tpu.dimension_semantics<parallel>], iteration_bounds = array<i64: 2, 1>, scalar_prefetch = 0 : i64, scratch_operands = 2 : i64, tpu.core_type = #tpu.core_type<tc>, window_params = [{transform_indices = @transform_0, window_bounds = array<i64: 1, 16, 16, 4>}, {transform_indices = @transform_1, window_bounds = array<i64: 1, 16, 16, 4>}]} {
    %cst = arith.constant 0.000000e+00 : f32
    %0 = vector.broadcast %cst : f32 to vector<1x2x19x4xf32>
    %c0 = arith.constant 0 : index
    %c0_0 = arith.constant 0 : index
    %c0_1 = arith.constant 0 : index
    %c0_2 = arith.constant 0 : index
    %1 = vector.load %arg4[%c0, %c0_0, %c0_1, %c0_2] : memref<1x19x19x4xf32, #tpu.memory_space<vmem>>, vector<1x2x19x4xf32>
    tpu.vector_store %arg4[%c0, %c0_0, %c0_1, %c0_2], %0 {strides = array<i32>} : memref<1x19x19x4xf32, #tpu.memory_space<vmem>>, vector<1x2x19x4xf32>,
    %cst_3 = arith.constant 0.000000e+00 : f32
    %2 = vector.broadcast %cst_3 : f32 to vector<1x1x19x4xf32>
    %c0_4 = arith.constant 0 : index
    %c18 = arith.constant 18 : index
    %c0_5 = arith.constant 0 : index
    %c0_6 = arith.constant 0 : index
    %3 = vector.load %arg4[%c0_4, %c18, %c0_5, %c0_6] : memref<1x19x19x4xf32, #tpu.memory_space<vmem>>, vector<1x1x19x4xf32>
    tpu.vector_store %arg4[%c0_4, %c18, %c0_5, %c0_6], %2 {strides = array<i32>} : memref<1x19x19x4xf32, #tpu.memory_space<vmem>>, vector<1x1x19x4xf32>,
    %cst_7 = arith.constant 0.000000e+00 : f32
    %4 = vector.broadcast %cst_7 : f32 to vector<1x16x2x4xf32>
    %c0_8 = arith.constant 0 : index
    %c2 = arith.constant 2 : index
    %c0_9 = arith.constant 0 : index
    %c0_10 = arith.constant 0 : index
    %5 = vector.load %arg4[%c0_8, %c2, %c0_9, %c0_10] : memref<1x19x19x4xf32, #tpu.memory_space<vmem>>, vector<1x16x2x4xf32>
    tpu.vector_store %arg4[%c0_8, %c2, %c0_9, %c0_10], %4 {strides = array<i32>} : memref<1x19x19x4xf32, #tpu.memory_space<vmem>>, vector<1x16x2x4xf32>,
    %cst_11 = arith.constant 0.000000e+00 : f32
    %6 = vector.broadcast %cst_11 : f32 to vector<1x16x1x4xf32>
    %c0_12 = arith.constant 0 : index
    %c2_13 = arith.constant 2 : index
    %c18_14 = arith.constant 18 : index
    %c0_15 = arith.constant 0 : index
    %7 = vector.load %arg4[%c0_12, %c2_13, %c18_14, %c0_15] : memref<1x19x19x4xf32, #tpu.memory_space<vmem>>, vector<1x16x1x4xf32>
    tpu.vector_store %arg4[%c0_12, %c2_13, %c18_14, %c0_15], %6 {strides = array<i32>} : memref<1x19x19x4xf32, #tpu.memory_space<vmem>>, vector<1x16x1x4xf32>,
    %c0_16 = arith.constant 0 : index
    %c0_17 = arith.constant 0 : index
    %c0_18 = arith.constant 0 : index
    %c0_19 = arith.constant 0 : index
    %8 = vector.load %arg2[%c0_16, %c0_17, %c0_18, %c0_19] : memref<1x16x16x4xf32, #tpu.memory_space<vmem>>, vector<1x16x16x4xf32>
    %c0_20 = arith.constant 0 : index
    %c2_21 = arith.constant 2 : index
    %c2_22 = arith.constant 2 : index
    %c0_23 = arith.constant 0 : index
    %9 = vector.load %arg4[%c0_20, %c2_21, %c2_22, %c0_23] : memref<1x19x19x4xf32, #tpu.memory_space<vmem>>, vector<1x16x16x4xf32>
    tpu.vector_store %arg4[%c0_20, %c2_21, %c2_22, %c0_23], %8 {strides = array<i32>} : memref<1x19x19x4xf32, #tpu.memory_space<vmem>>, vector<1x16x16x4xf32>,
    %c0_24 = arith.constant 0 : index
    %c0_25 = arith.constant 0 : index
    %c0_26 = arith.constant 0 : index
    %c0_27 = arith.constant 0 : index
    %10 = vector.load %arg4[%c0_24, %c0_25, %c0_26, %c0_27] : memref<1x19x19x4xf32, #tpu.memory_space<vmem>>, vector<1x19x16x4xf32>
    %cst_28 = arith.constant 1.250000e-01 : f32
    %11 = vector.broadcast %cst_28 : f32 to vector<1x19x16x4xf32>
    %12 = arith.mulf %10, %11 : vector<1x19x16x4xf32>
    %c0_29 = arith.constant 0 : index
    %c0_30 = arith.constant 0 : index
    %c1 = arith.constant 1 : index
    %c0_31 = arith.constant 0 : index
    %13 = vector.load %arg4[%c0_29, %c0_30, %c1, %c0_31] : memref<1x19x19x4xf32, #tpu.memory_space<vmem>>, vector<1x19x16x4xf32>
    %cst_32 = arith.constant 3.750000e-01 : f32
    %14 = vector.broadcast %cst_32 : f32 to vector<1x19x16x4xf32>
    %15 = arith.mulf %13, %14 : vector<1x19x16x4xf32>
    %16 = arith.addf %12, %15 : vector<1x19x16x4xf32>
    %c0_33 = arith.constant 0 : index
    %c0_34 = arith.constant 0 : index
    %c2_35 = arith.constant 2 : index
    %c0_36 = arith.constant 0 : index
    %17 = vector.load %arg4[%c0_33, %c0_34, %c2_35, %c0_36] : memref<1x19x19x4xf32, #tpu.memory_space<vmem>>, vector<1x19x16x4xf32>
    %cst_37 = arith.constant 3.750000e-01 : f32
    %18 = vector.broadcast %cst_37 : f32 to vector<1x19x16x4xf32>
    %19 = arith.mulf %17, %18 : vector<1x19x16x4xf32>
    %20 = arith.addf %16, %19 : vector<1x19x16x4xf32>
    %c0_38 = arith.constant 0 : index
    %c0_39 = arith.constant 0 : index
    %c3 = arith.constant 3 : index
    %c0_40 = arith.constant 0 : index
    %21 = vector.load %arg4[%c0_38, %c0_39, %c3, %c0_40] : memref<1x19x19x4xf32, #tpu.memory_space<vmem>>, vector<1x19x16x4xf32>
    %cst_41 = arith.constant 1.250000e-01 : f32
    %22 = vector.broadcast %cst_41 : f32 to vector<1x19x16x4xf32>
    %23 = arith.mulf %21, %22 : vector<1x19x16x4xf32>
    %24 = arith.addf %20, %23 : vector<1x19x16x4xf32>
    %c0_42 = arith.constant 0 : index
    %c0_43 = arith.constant 0 : index
    %c0_44 = arith.constant 0 : index
    %c0_45 = arith.constant 0 : index
    %25 = vector.load %arg5[%c0_42, %c0_43, %c0_44, %c0_45] : memref<1x19x16x4xf32, #tpu.memory_space<vmem>>, vector<1x19x16x4xf32>
    tpu.vector_store %arg5[%c0_42, %c0_43, %c0_44, %c0_45], %24 {strides = array<i32>} : memref<1x19x16x4xf32, #tpu.memory_space<vmem>>, vector<1x19x16x4xf32>,
    %c0_46 = arith.constant 0 : index
    %c0_47 = arith.constant 0 : index
    %c0_48 = arith.constant 0 : index
    %c0_49 = arith.constant 0 : index
    %26 = vector.load %arg5[%c0_46, %c0_47, %c0_48, %c0_49] : memref<1x19x16x4xf32, #tpu.memory_space<vmem>>, vector<1x16x16x4xf32>
    %cst_50 = arith.constant 1.250000e-01 : f32
    %27 = vector.broadcast %cst_50 : f32 to vector<1x16x16x4xf32>
    %28 = arith.mulf %26, %27 : vector<1x16x16x4xf32>
    %c0_51 = arith.constant 0 : index
    %c1_52 = arith.constant 1 : index
    %c0_53 = arith.constant 0 : index
    %c0_54 = arith.constant 0 : index
    %29 = vector.load %arg5[%c0_51, %c1_52, %c0_53, %c0_54] : memref<1x19x16x4xf32, #tpu.memory_space<vmem>>, vector<1x16x16x4xf32>
    %cst_55 = arith.constant 3.750000e-01 : f32
    %30 = vector.broadcast %cst_55 : f32 to vector<1x16x16x4xf32>
    %31 = arith.mulf %29, %30 : vector<1x16x16x4xf32>
    %32 = arith.addf %28, %31 : vector<1x16x16x4xf32>
    %c0_56 = arith.constant 0 : index
    %c2_57 = arith.constant 2 : index
    %c0_58 = arith.constant 0 : index
    %c0_59 = arith.constant 0 : index
    %33 = vector.load %arg5[%c0_56, %c2_57, %c0_58, %c0_59] : memref<1x19x16x4xf32, #tpu.memory_space<vmem>>, vector<1x16x16x4xf32>
    %cst_60 = arith.constant 3.750000e-01 : f32
    %34 = vector.broadcast %cst_60 : f32 to vector<1x16x16x4xf32>
    %35 = arith.mulf %33, %34 : vector<1x16x16x4xf32>
    %36 = arith.addf %32, %35 : vector<1x16x16x4xf32>
    %c0_61 = arith.constant 0 : index
    %c3_62 = arith.constant 3 : index
    %c0_63 = arith.constant 0 : index
    %c0_64 = arith.constant 0 : index
    %37 = vector.load %arg5[%c0_61, %c3_62, %c0_63, %c0_64] : memref<1x19x16x4xf32, #tpu.memory_space<vmem>>, vector<1x16x16x4xf32>
    %cst_65 = arith.constant 1.250000e-01 : f32
    %38 = vector.broadcast %cst_65 : f32 to vector<1x16x16x4xf32>
    %39 = arith.mulf %37, %38 : vector<1x16x16x4xf32>
    %40 = arith.addf %36, %39 : vector<1x16x16x4xf32>
    %c0_66 = arith.constant 0 : index
    %c0_67 = arith.constant 0 : index
    %c0_68 = arith.constant 0 : index
    %c0_69 = arith.constant 0 : index
    %41 = vector.load %arg3[%c0_66, %c0_67, %c0_68, %c0_69] : memref<1x16x16x4xf32, #tpu.memory_space<vmem>>, vector<1x16x16x4xf32>
    tpu.vector_store %arg3[%c0_66, %c0_67, %c0_68, %c0_69], %40 {strides = array<i32>} : memref<1x16x16x4xf32, #tpu.memory_space<vmem>>, vector<1x16x16x4xf32>,
    return
  }
  func.func @transform_0(%arg0: i32, %arg1: i32) -> (i32, i32, i32, i32) {
    %c0_i32 = arith.constant 0 : i32
    %c0_i32_0 = arith.constant 0 : i32
    %c0_i32_1 = arith.constant 0 : i32
    return %arg0, %c0_i32, %c0_i32_0, %arg1 : i32, i32, i32, i32
  }
  func.func @transform_1(%arg0: i32, %arg1: i32) -> (i32, i32, i32, i32) {
    %c0_i32 = arith.constant 0 : i32
    %c0_i32_0 = arith.constant 0 : i32
    %c0_i32_1 = arith.constant 0 : i32
    return %arg0, %c0_i32, %c0_i32_0, %arg1 : i32, i32, i32, i32
  }
}

</mosaic_0001>

<bundles_post_ra>
// kernel: tpu_custom_call.1
= control target key start
LH: loop header
LB: loop body
LE: loop exit
PB: predicated region body
PF: predicated region fallthrough
CT: control target
= control target key end

     0   :  { %s1258_s6 = smov 0   ;;  %s1260_s7 = smov 0   ;;  %s1579_s0 = inlined_call_operand.vmem [shape: f32[2,16,16,4], index: 0, kind: input, shape index: {}]   ;;  %s1580_s1 = inlined_call_operand.vmem [shape: f32[2,16,16,4], index: 1, kind: output, shape index: {}]  }
   0x1   :  { %s1262_s8 = smov 0  }
   0x2 LB: > { %s23_s9 = sadd.s32 1, %s1241_s7  ;;  %p1189_p0 = scmp.ge.s32.totalorder %s1245_s8, 1  ;;  %s1245_s8 = sphi %s1262_s8, %s11_s8   ;;  %s1241_s7 = sphi %s1260_s7, %s1582_s7   ;;  %s1237_s6 = sphi %s1258_s6, %s1581_s6  }
   0x3   : > { %p25_p1 = scmp.ge.s32.totalorder %s23_s9, 2  ;;  %p106_p2 = scmp.lt.s32.totalorder %s1245_s8, 3 }
   0x5   : > { %s1584_s9 = smov (%p25_p1, %s23_s9), 0  ;;  %p107_p3 = pnand %p1189_p0, %p106_p2 }
   0x6   : > { %p132_p4 = scmp.lt.s32.totalorder (!%p107_p3), %s1237_s6, 1 }
   0x7   : > { %110 = sbr.rel (%p107_p3) target bundleno = 171 (0xab), region = 24 }
   0xc   : > { %vm148_vm0 = vcmask 31744   ;;  %v1247_v0 = vmov 0.0   ;;  %vm151_vm1 = vcmask 26624   ;;  %vm161_vm2 = vcmask 25600   ;;  %s1586_s6 = smov (!%p132_p4, %s1237_s6), 1 }
   0xd   : > { %149 = vst.msk [vmem:[#allocation2] sm:$0xff] %vm148_vm0, %v1247_v0  ;;  %vm178_vm3 = vcmask 24576   ;;  %s1196_s10 = sshll.u32 %s1586_s6, 8 }
   0xe   : > { %150 = vst.msk [vmem:[#allocation2 + $0x8] sm:$0xff] %vm148_vm0, %v1247_v0  ;;  %s1321_s13 = scalar_lea.vmem %s1579_s0, %s1196_s10  ;;  %s1503_s16 = scalar_lea.vmem %s1580_s1, %s1196_s10 }
   0xf   : > { %153 = vst.msk [vmem:[#allocation2 + $0x18] sm:$0xff] %vm148_vm0, %v1247_v0  ;;  %v195_v1 = vld [vmem:[%s1321_s13] sm:$0xff]  ;;  %v196_v2 = vld [vmem:[%s1321_s13 + $0x8] sm:$0xff]  ;;  %v197_v3 = vld [vmem:[%s1321_s13 + $0x10] sm:$0xff] }
  0x10   : > { %154 = vst.msk [vmem:[#allocation2 + $0x20] sm:$0xff] %vm148_vm0, %v1247_v0  ;;  %v198_v4 = vld [vmem:[%s1321_s13 + $0x18] sm:$0xff]  ;;  %v199_v5 = vld [vmem:[%s1321_s13 + $0x20] sm:$0xff]  ;;  %v200_v9 = vld [vmem:[%s1321_s13 + $0x28] sm:$0xff] }
  0x11   : > { %157 = vst.msk [vmem:[#allocation2 + $0x1b0] sm:$0xff] %vm148_vm0, %v1247_v0  ;;  %v201_v15 = vld [vmem:[%s1321_s13 + $0x30] sm:$0xff]  ;;  %v202_v20 = vld [vmem:[%s1321_s13 + $0x38] sm:$0xff]  ;;  %v203_v39 = vld [vmem:[%s1321_s13 + $0x40] sm:$0xff] }
  0x12   : > { %158 = vst.msk [vmem:[#allocation2 + $0x1b8] sm:$0xff] %vm148_vm0, %v1247_v0  ;;  %v204_v44 = vld [vmem:[%s1321_s13 + $0x48] sm:$0xff]  ;;  %v205_v45 = vld [vmem:[%s1321_s13 + $0x50] sm:$0xff]  ;;  %v206_v46 = vld [vmem:[%s1321_s13 + $0x58] sm:$0xff] }
  0x13   : > { %152 = vst.msk [vmem:[#allocation2 + $0x10] sm:$0x7] %vm151_vm1, %v1247_v0  ;;  %v207_v48 = vld [vmem:[%s1321_s13 + $0x60] sm:$0xff]  ;;  %v208_v56 = vld [vmem:[%s1321_s13 + $0x68] sm:$0xff]  ;;  %v209_v63 = vld [vmem:[%s1321_s13 + $0x70] sm:$0xff] }
  0x14   : > { %155 = vst.msk [vmem:[#allocation2 + $0x28] sm:$0x7] %vm151_vm1, %v1247_v0  ;;  %v259_v6 = vld [vmem:[#allocation2] sm:$0xff] }
  0x15   : > { %159 = vst.msk [vmem:[#allocation2 + $0x1c0] sm:$0x7] %vm151_vm1, %v1247_v0  ;;  %v335_v7 = vld [vmem:[#allocation2 + $0x1] sm:$0xff]  ;;  %v297_v10 = vmul.f32 0.125, %v259_v6 }
  0x16   : > { %162 = vst.msk [vmem:[#allocation2 + $0x30] sm:$0x3] %vm161_vm2, %v1247_v0  ;;  %v449_v8 = vld [vmem:[#allocation2 + $0x2] sm:$0xff]  ;;  %v373_v11 = vmul.f32 0.375, %v335_v7  ;;  %v261_v25 = vld [vmem:[#allocation2 + $0x18] sm:$0xff] }
  0x17   : > { %163 = vst.msk [vmem:[#allocation2 + $0x48] sm:$0x3] %vm161_vm2, %v1247_v0  ;;  %v487_v12 = vmul.f32 0.375, %v449_v8  ;;  %v563_v13 = vld [vmem:[#allocation2 + $0x3] sm:$0xff]  ;;  %v337_v26 = vld [vmem:[#allocation2 + $0x19] sm:$0xff]  ;;  %v299_v27 = vmul.f32 0.125, %v261_v25 }
  0x18   : > { %164 = vst.msk [vmem:[#allocation2 + $0x60] sm:$0x3] %vm161_vm2, %v1247_v0  ;;  %v260_v14 = vld [vmem:[#allocation2 + $0x8] sm:$0xff]  ;;  %v411_v21 = vadd.f32 %v373_v11, %v297_v10  ;;  %v601_v22 = vmul.f32 0.125, %v563_v13  ;;  %v375_v28 = vmul.f32 0.375, %v337_v26  ;;  %v451_v29 = vld [vmem:[#allocation2 + $0x1a] sm:$0xff] }
  0x19   : > { %165 = vst.msk [vmem:[#allocation2 + $0x78] sm:$0x3] %vm161_vm2, %v1247_v0  ;;  %v298_v16 = vmul.f32 0.125, %v260_v14  ;;  %v565_v30 = vld [vmem:[#allocation2 + $0x1b] sm:$0xff]  ;;  %v489_v35 = vmul.f32 0.375, %v451_v29 }
  0x1a   : > { %166 = vst.msk [vmem:[#allocation2 + $0x90] sm:$0x3] %vm161_vm2, %v1247_v0  ;;  %v336_v17 = vld [vmem:[#allocation2 + $0x9] sm:$0xff]  ;;  %v262_v31 = vld [vmem:[#allocation2 + $0x20] sm:$0xff]  ;;  %v525_v32 = vadd.f32 %v487_v12, %v411_v21  ;;  %v413_v40 = vadd.f32 %v375_v28, %v299_v27  ;;  %v603_v50 = vmul.f32 0.125, %v565_v30  ;;  %v210_v7 = vld [vmem:[%s1321_s13 + $0x78] sm:$0xff] }
  0x1b   : > { %167 = vst.msk [vmem:[#allocation2 + $0xa8] sm:$0x3] %vm161_vm2, %v1247_v0  ;;  %v450_v18 = vld [vmem:[#allocation2 + $0xa] sm:$0xff]  ;;  %v374_v23 = vmul.f32 0.375, %v336_v17  ;;  %v338_v36 = vld [vmem:[#allocation2 + $0x21] sm:$0xff]  ;;  %v300_v41 = vmul.f32 0.125, %v262_v31 }
  0x1c   : > { %168 = vst.msk [vmem:[#allocation2 + $0xc0] sm:$0x3] %vm161_vm2, %v1247_v0  ;;  %v564_v19 = vld [vmem:[#allocation2 + $0xb] sm:$0xff]  ;;  %v488_v24 = vmul.f32 0.375, %v450_v18  ;;  %v452_v37 = vld [vmem:[#allocation2 + $0x22] sm:$0xff]  ;;  %v376_v42 = vmul.f32 0.375, %v338_v36  ;;  %v527_v49 = vadd.f32 %v489_v35, %v413_v40  ;;  %v1351_v57 = vadd.f32 %v601_v22, %v525_v32 }
  0x1d   : > { %169 = vst.msk [vmem:[#allocation2 + $0xd8] sm:$0x3] %vm161_vm2, %v1247_v0  ;;  %v412_v33 = vadd.f32 %v374_v23, %v298_v16  ;;  %v602_v34 = vmul.f32 0.125, %v564_v19  ;;  %v566_v38 = vld [vmem:[#allocation2 + $0x23] sm:$0xff]  ;;  %v490_v43 = vmul.f32 0.375, %v452_v37  ;;  %v213_v30 = vld [vmem:[%s1321_s13 + $0x90] sm:$0xff] }
  0x1e   : > { %170 = vst.msk [vmem:[#allocation2 + $0xf0] sm:$0x3] %vm161_vm2, %v1247_v0  ;;  %v414_v51 = vadd.f32 %v376_v42, %v300_v41  ;;  %v604_v52 = vmul.f32 0.125, %v566_v38  ;;  %v211_v14 = vld [vmem:[%s1321_s13 + $0x80] sm:$0xff]  ;;  %v212_v22 = vld [vmem:[%s1321_s13 + $0x88] sm:$0xff]  ;;  %v214_v37 = vld [vmem:[%s1321_s13 + $0x98] sm:$0xff] }
  0x1f   : > { %171 = vst.msk [vmem:[#allocation2 + $0x108] sm:$0x3] %vm161_vm2, %v1247_v0  ;;  %v526_v47 = vadd.f32 %v488_v24, %v412_v33 }
  0x20   : > { %172 = vst.msk [vmem:[#allocation2 + $0x120] sm:$0x3] %vm161_vm2, %v1247_v0 }
  0x21   : > { %173 = vst.msk [vmem:[#allocation2 + $0x138] sm:$0x3] %vm161_vm2, %v1247_v0 }
  0x22   : > { %174 = vst.msk [vmem:[#allocation2 + $0x150] sm:$0x3] %vm161_vm2, %v1247_v0 }
  0x23   : > { %175 = vst.msk [vmem:[#allocation2 + $0x168] sm:$0x3] %vm161_vm2, %v1247_v0 }
  0x24   : > { %176 = vst.msk [vmem:[#allocation2 + $0x180] sm:$0x3] %vm161_vm2, %v1247_v0 }
  0x25   : > { %177 = vst.msk [vmem:[#allocation2 + $0x198] sm:$0x3] %vm161_vm2, %v1247_v0 }
  0x26   : > { %179 = vst.msk [vmem:[#allocation2 + $0x42] sm:$0x1] %vm178_vm3, %v1247_v0 }
  0x27   : > { %180 = vst.msk [vmem:[#allocation2 + $0x5a] sm:$0x1] %vm178_vm3, %v1247_v0 }
  0x28   : > { %181 = vst.msk [vmem:[#allocation2 + $0x72] sm:$0x1] %vm178_vm3, %v1247_v0 }
  0x29   : > { %182 = vst.msk [vmem:[#allocation2 + $0x8a] sm:$0x1] %vm178_vm3, %v1247_v0 }
  0x2a   : > { %183 = vst.msk [vmem:[#allocation2 + $0xa2] sm:$0x1] %vm178_vm3, %v1247_v0 }
  0x2b   : > { %184 = vst.msk [vmem:[#allocation2 + $0xba] sm:$0x1] %vm178_vm3, %v1247_v0 }
  0x2c   : > { %185 = vst.msk [vmem:[#allocation2 + $0xd2] sm:$0x1] %vm178_vm3, %v1247_v0 }
  0x2d   : > { %186 = vst.msk [vmem:[#allocation2 + $0xea] sm:$0x1] %vm178_vm3, %v1247_v0 }
  0x2e   : > { %187 = vst.msk [vmem:[#allocation2 + $0x102] sm:$0x1] %vm178_vm3, %v1247_v0 }
  0x2f   : > { %188 = vst.msk [vmem:[#allocation2 + $0x11a] sm:$0x1] %vm178_vm3, %v1247_v0 }
  0x30   : > { %189 = vst.msk [vmem:[#allocation2 + $0x132] sm:$0x1] %vm178_vm3, %v1247_v0 }
  0x31   : > { %190 = vst.msk [vmem:[#allocation2 + $0x14a] sm:$0x1] %vm178_vm3, %v1247_v0 }
  0x32   : > { %191 = vst.msk [vmem:[#allocation2 + $0x162] sm:$0x1] %vm178_vm3, %v1247_v0 }
  0x33   : > { %192 = vst.msk [vmem:[#allocation2 + $0x17a] sm:$0x1] %vm178_vm3, %v1247_v0 }
  0x34   : > { %193 = vst.msk [vmem:[#allocation2 + $0x192] sm:$0x1] %vm178_vm3, %v1247_v0 }
  0x35   : > { %194 = vst.msk [vmem:[#allocation2 + $0x1aa] sm:$0x1] %vm178_vm3, %v1247_v0  ;;  %v1355_v0 = vadd.f32 %v602_v34, %v526_v47 }
  0x36   : > { %227 = vst.msk [vmem:[#allocation2 + $0x32] sm:$0xff] %vm148_vm0, %v195_v1  ;;  %v528_v1 = vadd.f32 %v490_v43, %v414_v51 }
  0x37   : > { %228 = vst.msk [vmem:[#allocation2 + $0x3a] sm:$0xff] %vm148_vm0, %v196_v2 }
  0x38   : > { %229 = vst.msk [vmem:[#allocation2 + $0x4a] sm:$0xff] %vm148_vm0, %v197_v3  ;;  %v1363_v16 = vadd.f32 %v604_v52, %v528_v1 }
  0x39   : > { %230 = vst.msk [vmem:[#allocation2 + $0x52] sm:$0xff] %vm148_vm0, %v198_v4 }
  0x3a   : > { %231 = vst.msk [vmem:[#allocation2 + $0x62] sm:$0xff] %vm148_vm0, %v199_v5 }
  0x3b   : > { %232 = vst.msk [vmem:[#allocation2 + $0x6a] sm:$0xff] %vm148_vm0, %v200_v9 }
  0x3c   : > { %233 = vst.msk [vmem:[#allocation2 + $0x7a] sm:$0xff] %vm148_vm0, %v201_v15  ;;  %v1361_v15 = vadd.f32 %v603_v50, %v527_v49 }
  0x3d   : > { %234 = vst.msk [vmem:[#allocation2 + $0x82] sm:$0xff] %vm148_vm0, %v202_v20  ;;  %v263_v53 = vld [vmem:[#allocation2 + $0x30] sm:$0xff] }
  0x3e   : > { %v339_v54 = vld [vmem:[#allocation2 + $0x31] sm:$0xff]  ;;  %235 = vst.msk [vmem:[#allocation2 + $0x92] sm:$0xff] %vm148_vm0, %v203_v39  ;;  %v301_v58 = vmul.f32 0.125, %v263_v53  ;;  %v340_v4 = vld [vmem:[#allocation2 + $0x39] sm:$0xff]  ;;  %v216_v53 = vld [vmem:[%s1321_s13 + $0xa8] sm:$0xff] }
  0x3f   : > { %v453_v55 = vld [vmem:[#allocation2 + $0x32] sm:$0xff]  ;;  %v377_v59 = vmul.f32 0.375, %v339_v54  ;;  %236 = vst.msk [vmem:[#allocation2 + $0x9a] sm:$0xff] %vm148_vm0, %v204_v44  ;;  %v454_v5 = vld [vmem:[#allocation2 + $0x3a] sm:$0xff]  ;;  %v378_v9 = vmul.f32 0.375, %v340_v4  ;;  %v265_v12 = vld [vmem:[#allocation2 + $0x48] sm:$0xff] }
  0x40   : > { %v491_v60 = vmul.f32 0.375, %v453_v55  ;;  %v567_v61 = vld [vmem:[#allocation2 + $0x33] sm:$0xff]  ;;  %v568_v6 = vld [vmem:[#allocation2 + $0x3b] sm:$0xff]  ;;  %237 = vst.msk [vmem:[#allocation2 + $0xaa] sm:$0xff] %vm148_vm0, %v205_v45  ;;  %v492_v10 = vmul.f32 0.375, %v454_v5  ;;  %v341_v13 = vld [vmem:[#allocation2 + $0x49] sm:$0xff] }
  0x41   : > { %v264_v62 = vld [vmem:[#allocation2 + $0x38] sm:$0xff]  ;;  %v605_v2 = vmul.f32 0.125, %v567_v61  ;;  %v415_v8 = vadd.f32 %v377_v59, %v301_v58  ;;  %v606_v11 = vmul.f32 0.125, %v568_v6  ;;  %238 = vst.msk [vmem:[#allocation2 + $0xb2] sm:$0xff] %vm148_vm0, %v206_v46  ;;  %v303_v17 = vmul.f32 0.125, %v265_v12  ;;  %v455_v19 = vld [vmem:[#allocation2 + $0x4a] sm:$0xff] }
  0x42   : > { %v302_v3 = vmul.f32 0.125, %v264_v62  ;;  %v379_v18 = vmul.f32 0.375, %v341_v13  ;;  %v569_v20 = vld [vmem:[#allocation2 + $0x4b] sm:$0xff]  ;;  %239 = vst.msk [vmem:[#allocation2 + $0xc2] sm:$0xff] %vm148_vm0, %v207_v48  ;;  %v493_v25 = vmul.f32 0.375, %v455_v19  ;;  %v570_v29 = vld [vmem:[#allocation2 + $0x53] sm:$0xff] }
  0x43   : > { %v266_v21 = vld [vmem:[#allocation2 + $0x50] sm:$0xff]  ;;  %v529_v23 = vadd.f32 %v491_v60, %v415_v8  ;;  %v607_v26 = vmul.f32 0.125, %v569_v20  ;;  %240 = vst.msk [vmem:[#allocation2 + $0xca] sm:$0xff] %vm148_vm0, %v208_v56  ;;  %v267_v35 = vld [vmem:[#allocation2 + $0x60] sm:$0xff]  ;;  %v608_v40 = vmul.f32 0.125, %v570_v29  ;;  %v268_v44 = vld [vmem:[#allocation2 + $0x68] sm:$0xff] }
  0x44   : > { %v416_v24 = vadd.f32 %v378_v9, %v302_v3  ;;  %v342_v27 = vld [vmem:[#allocation2 + $0x51] sm:$0xff]  ;;  %v417_v31 = vadd.f32 %v379_v18, %v303_v17  ;;  %v304_v32 = vmul.f32 0.125, %v266_v21  ;;  %v343_v36 = vld [vmem:[#allocation2 + $0x61] sm:$0xff]  ;;  %241 = vst.msk [vmem:[#allocation2 + $0xda] sm:$0xff] %vm148_vm0, %v209_v63  ;;  %v305_v41 = vmul.f32 0.125, %v267_v35  ;;  %v344_v50 = vld [vmem:[#allocation2 + $0x69] sm:$0xff] }
  0x45   : > { %v456_v28 = vld [vmem:[#allocation2 + $0x52] sm:$0xff]  ;;  %v380_v33 = vmul.f32 0.375, %v342_v27  ;;  %v1371_v38 = vadd.f32 %v605_v2, %v529_v23  ;;  %v457_v42 = vld [vmem:[#allocation2 + $0x62] sm:$0xff]  ;;  %242 = vst.msk [vmem:[#allocation2 + $0xe2] sm:$0xff] %vm148_vm0, %v210_v7  ;;  %v381_v48 = vmul.f32 0.375, %v343_v36  ;;  %v458_v51 = vld [vmem:[#allocation2 + $0x6a] sm:$0xff] }
  0x46   : > { %v494_v34 = vmul.f32 0.375, %v456_v28  ;;  %v530_v39 = vadd.f32 %v492_v10, %v416_v24  ;;  %v571_v43 = vld [vmem:[#allocation2 + $0x63] sm:$0xff]  ;;  %v531_v46 = vadd.f32 %v493_v25, %v417_v31  ;;  %v495_v49 = vmul.f32 0.375, %v457_v42  ;;  %v572_v52 = vld [vmem:[#allocation2 + $0x6b] sm:$0xff]  ;;  %243 = vst.msk [vmem:[#allocation2 + $0xf2] sm:$0xff] %vm148_vm0, %v211_v14  ;;  %v269_v59 = vld [vmem:[#allocation2 + $0x78] sm:$0xff] }
  0x47   : > { %v215_v45 = vld [vmem:[%s1321_s13 + $0xa0] sm:$0xff]  ;;  %v418_v47 = vadd.f32 %v380_v33, %v304_v32  ;;  %v609_v55 = vmul.f32 0.125, %v571_v43  ;;  %v306_v56 = vmul.f32 0.125, %v268_v44  ;;  %v382_v58 = vmul.f32 0.375, %v344_v50  ;;  %244 = vst.msk [vmem:[#allocation2 + $0xfa] sm:$0xff] %vm148_vm0, %v212_v22  ;;  %v217_v61 = vld [vmem:[%s1321_s13 + $0xb0] sm:$0xff] }
  0x48   : > { %v1377_v54 = vadd.f32 %v606_v11, %v530_v39  ;;  %v345_v60 = vld [vmem:[#allocation2 + $0x79] sm:$0xff]  ;;  %v1381_v62 = vadd.f32 %v607_v26, %v531_v46  ;;  %v419_v1 = vadd.f32 %v381_v48, %v305_v41  ;;  %v496_v2 = vmul.f32 0.375, %v458_v51  ;;  %245 = vst.msk [vmem:[#allocation2 + $0x10a] sm:$0xff] %vm148_vm0, %v213_v30  ;;  %v346_v11 = vld [vmem:[#allocation2 + $0x81] sm:$0xff]  ;;  %v271_v21 = vld [vmem:[#allocation2 + $0x90] sm:$0xff] }
  0x49   : > { %v532_v63 = vadd.f32 %v494_v34, %v418_v47  ;;  %v459_v3 = vld [vmem:[#allocation2 + $0x7a] sm:$0xff]  ;;  %v420_v7 = vadd.f32 %v382_v58, %v306_v56  ;;  %v610_v8 = vmul.f32 0.125, %v572_v52  ;;  %v307_v9 = vmul.f32 0.125, %v269_v59  ;;  %v460_v12 = vld [vmem:[#allocation2 + $0x82] sm:$0xff]  ;;  %246 = vst.msk [vmem:[#allocation2 + $0x112] sm:$0xff] %vm148_vm0, %v214_v37  ;;  %v347_v22 = vld [vmem:[#allocation2 + $0x91] sm:$0xff] }
  0x4a   : > { %v573_v4 = vld [vmem:[#allocation2 + $0x7b] sm:$0xff]  ;;  %v383_v10 = vmul.f32 0.375, %v345_v60  ;;  %v533_v17 = vadd.f32 %v495_v49, %v419_v1  ;;  %v497_v18 = vmul.f32 0.375, %v459_v3  ;;  %v574_v20 = vld [vmem:[#allocation2 + $0x83] sm:$0xff]  ;;  %247 = vst.msk [vmem:[#allocation2 + $0x122] sm:$0xff] %vm148_vm0, %v215_v45  ;;  %v384_v27 = vmul.f32 0.375, %v346_v11 }
  0x4b   : > { %v270_v5 = vld [vmem:[#allocation2 + $0x80] sm:$0xff]  ;;  %v218_v6 = vld [vmem:[%s1321_s13 + $0xb8] sm:$0xff]  ;;  %v1387_v14 = vadd.f32 %v608_v40, %v532_v63  ;;  %v611_v19 = vmul.f32 0.125, %v573_v4  ;;  %v220_v23 = vld [vmem:[%s1321_s13 + $0xc8] sm:$0xff]  ;;  %v534_v24 = vadd.f32 %v496_v2, %v420_v7  ;;  %248 = vst.msk [vmem:[#allocation2 + $0x12a] sm:$0xff] %vm148_vm0, %v216_v53  ;;  %v498_v33 = vmul.f32 0.375, %v460_v12 }
  0x4c   : > { %v219_v13 = vld [vmem:[%s1321_s13 + $0xc0] sm:$0xff]  ;;  %v421_v25 = vadd.f32 %v383_v10, %v307_v9  ;;  %v308_v26 = vmul.f32 0.125, %v270_v5  ;;  %v461_v28 = vld [vmem:[#allocation2 + $0x92] sm:$0xff]  ;;  %v1393_v32 = vadd.f32 %v609_v55, %v533_v17  ;;  %v612_v34 = vmul.f32 0.125, %v574_v20  ;;  %249 = vst.msk [vmem:[#allocation2 + $0x13a] sm:$0xff] %vm148_vm0, %v217_v61  ;;  %v273_v45 = vld [vmem:[#allocation2 + $0xa8] sm:$0xff] }
  0x4d   : > { %v575_v29 = vld [vmem:[#allocation2 + $0x93] sm:$0xff]  ;;  %v309_v35 = vmul.f32 0.125, %v271_v21  ;;  %v1397_v40 = vadd.f32 %v610_v8, %v534_v24  ;;  %v385_v43 = vmul.f32 0.375, %v347_v22  ;;  %v576_v44 = vld [vmem:[#allocation2 + $0x9b] sm:$0xff]  ;;  %v349_v46 = vld [vmem:[#allocation2 + $0xa9] sm:$0xff]  ;;  %250 = vst.msk [vmem:[#allocation2 + $0x142] sm:$0xff] %vm148_vm0, %v218_v6 }
  0x4e   : > { %v272_v30 = vld [vmem:[#allocation2 + $0x98] sm:$0xff]  ;;  %v221_v31 = vld [vmem:[%s1321_s13 + $0xd0] sm:$0xff]  ;;  %v535_v41 = vadd.f32 %v497_v18, %v421_v25  ;;  %v422_v42 = vadd.f32 %v384_v27, %v308_v26  ;;  %v223_v47 = vld [vmem:[%s1321_s13 + $0xe0] sm:$0xff]  ;;  %v499_v48 = vmul.f32 0.375, %v461_v28  ;;  %v613_v49 = vmul.f32 0.125, %v575_v29  ;;  %251 = vst.msk [vmem:[#allocation2 + $0x152] sm:$0xff] %vm148_vm0, %v219_v13 }
  0x4f   : > { %v348_v36 = vld [vmem:[#allocation2 + $0x99] sm:$0xff]  ;;  %v310_v50 = vmul.f32 0.125, %v272_v30  ;;  %v463_v52 = vld [vmem:[#allocation2 + $0xaa] sm:$0xff]  ;;  %v423_v58 = vadd.f32 %v385_v43, %v309_v35  ;;  %252 = vst.msk [vmem:[#allocation2 + $0x15a] sm:$0xff] %vm148_vm0, %v220_v23  ;;  %v614_v3 = vmul.f32 0.125, %v576_v44  ;;  %v311_v4 = vmul.f32 0.125, %v273_v45 }
  0x50   : > { %v462_v37 = vld [vmem:[#allocation2 + $0x9a] sm:$0xff]  ;;  %v386_v51 = vmul.f32 0.375, %v348_v36  ;;  %v224_v53 = vld [vmem:[%s1321_s13 + $0xe8] sm:$0xff]  ;;  %v1403_v55 = vadd.f32 %v611_v19, %v535_v41  ;;  %v536_v56 = vadd.f32 %v498_v33, %v422_v42  ;;  %v274_v61 = vld [vmem:[#allocation2 + $0xb0] sm:$0xff]  ;;  %v387_v5 = vmul.f32 0.375, %v349_v46  ;;  %253 = vst.msk [vmem:[#allocation2 + $0x16a] sm:$0xff] %vm148_vm0, %v221_v31 }
  0x51   : > { %v222_v39 = vld [vmem:[%s1321_s13 + $0xd8] sm:$0xff]  ;;  %v500_v59 = vmul.f32 0.375, %v462_v37  ;;  %v577_v60 = vld [vmem:[#allocation2 + $0xab] sm:$0xff]  ;;  %v537_v10 = vadd.f32 %v499_v48, %v423_v58  ;;  %v501_v11 = vmul.f32 0.375, %v463_v52  ;;  %v275_v13 = vld [vmem:[#allocation2 + $0xc0] sm:$0xff]  ;;  %v312_v21 = vmul.f32 0.125, %v274_v61 }
  0x52   : > { %v350_v63 = vld [vmem:[#allocation2 + $0xb1] sm:$0xff]  ;;  %v424_v2 = vadd.f32 %v386_v51, %v310_v50  ;;  %v1409_v9 = vadd.f32 %v612_v34, %v536_v56  ;;  %v615_v12 = vmul.f32 0.125, %v577_v60  ;;  %v351_v17 = vld [vmem:[#allocation2 + $0xc1] sm:$0xff]  ;;  %254 = vst.msk [vmem:[#allocation2 + $0x172] sm:$0xff] %vm148_vm0, %v222_v39  ;;  %v425_v20 = vadd.f32 %v387_v5, %v311_v4  ;;  %v352_v25 = vld [vmem:[#allocation2 + $0xc9] sm:$0xff] }
  0x53   : > { %v225_v1 = vld [vmem:[%s1321_s13 + $0xf0] sm:$0xff]  ;;  %v226_v8 = vld [vmem:[%s1321_s13 + $0xf8] sm:$0xff]  ;;  %v465_v18 = vld [vmem:[#allocation2 + $0xc2] sm:$0xff]  ;;  %v388_v22 = vmul.f32 0.375, %v350_v63  ;;  %255 = vst.msk [vmem:[#allocation2 + $0x182] sm:$0xff] %vm148_vm0, %v223_v47  ;;  %v1413_v26 = vadd.f32 %v613_v49, %v537_v10  ;;  %v313_v29 = vmul.f32 0.125, %v275_v13 }
  0x54   : > { %v464_v6 = vld [vmem:[#allocation2 + $0xb2] sm:$0xff]  ;;  %v538_v19 = vadd.f32 %v500_v59, %v424_v2  ;;  %v579_v23 = vld [vmem:[#allocation2 + $0xc3] sm:$0xff]  ;;  %256 = vst.msk [vmem:[#allocation2 + $0x18a] sm:$0xff] %vm148_vm0, %v224_v53  ;;  %v539_v34 = vadd.f32 %v501_v11, %v425_v20  ;;  %v389_v36 = vmul.f32 0.375, %v351_v17  ;;  %v467_v41 = vld [vmem:[#allocation2 + $0xda] sm:$0xff]  ;;  %v503_v42 = vmul.f32 0.375, %v465_v18 }
  0x55   : > { %v578_v7 = vld [vmem:[#allocation2 + $0xb3] sm:$0xff]  ;;  %v276_v24 = vld [vmem:[#allocation2 + $0xc8] sm:$0xff]  ;;  %v502_v27 = vmul.f32 0.375, %v464_v6  ;;  %v426_v35 = vadd.f32 %v388_v22, %v312_v21  ;;  %257 = vst.msk [vmem:[#allocation2 + $0x19a] sm:$0xff] %vm148_vm0, %v225_v1  ;;  %v617_v43 = vmul.f32 0.125, %v579_v23  ;;  %v390_v45 = vmul.f32 0.375, %v352_v25 }
  0x56   : > { %v616_v28 = vmul.f32 0.125, %v578_v7  ;;  %v466_v30 = vld [vmem:[#allocation2 + $0xca] sm:$0xff]  ;;  %v1416_v33 = vadd.f32 %v614_v3, %v538_v19  ;;  %v277_v37 = vld [vmem:[#allocation2 + $0xd8] sm:$0xff]  ;;  %v314_v44 = vmul.f32 0.125, %v276_v24  ;;  %258 = vst.msk [vmem:[#allocation2 + $0x1a2] sm:$0xff] %vm148_vm0, %v226_v8  ;;  %v1420_v47 = vadd.f32 %v615_v12, %v539_v34  ;;  %v278_v51 = vld [vmem:[#allocation2 + $0xe0] sm:$0xff] }
  0x57   : > { %v580_v31 = vld [vmem:[#allocation2 + $0xcb] sm:$0xff]  ;;  %v353_v39 = vld [vmem:[#allocation2 + $0xd9] sm:$0xff]  ;;  %v540_v48 = vadd.f32 %v502_v27, %v426_v35  ;;  %v427_v49 = vadd.f32 %v389_v36, %v313_v29  ;;  %v504_v50 = vmul.f32 0.375, %v466_v30  ;;  %v354_v52 = vld [vmem:[#allocation2 + $0xe1] sm:$0xff]  ;;  %677 = vst.msk [vmem:[#allocation3] sm:$0xff] %vm148_vm0, %v1351_v57  ;;  %v315_v59 = vmul.f32 0.125, %v277_v37 }
  0x58   : > { %v581_v46 = vld [vmem:[#allocation2 + $0xdb] sm:$0xff]  ;;  %v428_v56 = vadd.f32 %v390_v45, %v314_v44  ;;  %v618_v58 = vmul.f32 0.125, %v580_v31  ;;  %v391_v60 = vmul.f32 0.375, %v353_v39  ;;  %v582_v61 = vld [vmem:[#allocation2 + $0xe3] sm:$0xff]  ;;  %v279_v63 = vld [vmem:[#allocation2 + $0xf0] sm:$0xff]  ;;  %678 = vst.msk [vmem:[#allocation3 + $0x8] sm:$0xff] %vm148_vm0, %v1355_v0 }
  0x59   : > { %v468_v53 = vld [vmem:[#allocation2 + $0xe2] sm:$0xff]  ;;  %v1426_v1 = vadd.f32 %v616_v28, %v540_v48  ;;  %v541_v2 = vadd.f32 %v503_v42, %v427_v49  ;;  %v505_v3 = vmul.f32 0.375, %v467_v41  ;;  %v619_v4 = vmul.f32 0.125, %v581_v46  ;;  %v355_v5 = vld [vmem:[#allocation2 + $0xf1] sm:$0xff]  ;;  %679 = vst.msk [vmem:[#allocation3 + $0x10] sm:$0xff] %vm148_vm0, %v1361_v15  ;;  %v356_v13 = vld [vmem:[#allocation2 + $0xf9] sm:$0xff] }
  0x5a   : > { %v469_v6 = vld [vmem:[#allocation2 + $0xf2] sm:$0xff]  ;;  %v542_v57 = vadd.f32 %v504_v50, %v428_v56  ;;  %v429_v7 = vadd.f32 %v391_v60, %v315_v59  ;;  %v316_v8 = vmul.f32 0.125, %v278_v51  ;;  %v392_v10 = vmul.f32 0.375, %v354_v52  ;;  %680 = vst.msk [vmem:[#allocation3 + $0x18] sm:$0xff] %vm148_vm0, %v1363_v16  ;;  %v470_v20 = vld [vmem:[#allocation2 + $0xfa] sm:$0xff]  ;;  %v281_v25 = vld [vmem:[#allocation2 + $0x108] sm:$0xff] }
  0x5b   : > { %v583_v11 = vld [vmem:[#allocation2 + $0xf3] sm:$0xff]  ;;  %v1432_v0 = vadd.f32 %v617_v43, %v541_v2  ;;  %v506_v17 = vmul.f32 0.375, %v468_v53  ;;  %v620_v18 = vmul.f32 0.125, %v582_v61  ;;  %v317_v19 = vmul.f32 0.125, %v279_v63  ;;  %v584_v21 = vld [vmem:[#allocation2 + $0xfb] sm:$0xff]  ;;  %681 = vst.msk [vmem:[#allocation3 + $0x20] sm:$0xff] %vm148_vm0, %v1371_v38 }
  0x5c   : > { %v280_v12 = vld [vmem:[#allocation2 + $0xf8] sm:$0xff]  ;;  %v1436_v15 = vadd.f32 %v618_v58, %v542_v57  ;;  %v543_v22 = vadd.f32 %v505_v3, %v429_v7  ;;  %v430_v23 = vadd.f32 %v392_v10, %v316_v8  ;;  %v393_v24 = vmul.f32 0.375, %v355_v5  ;;  %v357_v27 = vld [vmem:[#allocation2 + $0x109] sm:$0xff]  ;;  %682 = vst.msk [vmem:[#allocation3 + $0x28] sm:$0xff] %vm148_vm0, %v1377_v54  ;;  %v283_v48 = vld [vmem:[#allocation2 + $0x120] sm:$0xff] }
  0x5d   : > { %v471_v28 = vld [vmem:[#allocation2 + $0x10a] sm:$0xff]  ;;  %v507_v16 = vmul.f32 0.375, %v469_v6  ;;  %v621_v29 = vmul.f32 0.125, %v583_v11  ;;  %v318_v30 = vmul.f32 0.125, %v280_v12  ;;  %v394_v31 = vmul.f32 0.375, %v356_v13  ;;  %683 = vst.msk [vmem:[#allocation3 + $0x30] sm:$0xff] %vm148_vm0, %v1381_v62 }
  0x5e   : > { %v585_v34 = vld [vmem:[#allocation2 + $0x10b] sm:$0xff]  ;;  %v1442_v38 = vadd.f32 %v619_v4, %v543_v22  ;;  %v544_v35 = vadd.f32 %v506_v17, %v430_v23  ;;  %v431_v36 = vadd.f32 %v393_v24, %v317_v19  ;;  %v508_v37 = vmul.f32 0.375, %v470_v20  ;;  %684 = vst.msk [vmem:[#allocation3 + $0x38] sm:$0xff] %vm148_vm0, %v1387_v14  ;;  %v586_v46 = vld [vmem:[#allocation2 + $0x113] sm:$0xff]  ;;  %v359_v52 = vld [vmem:[#allocation2 + $0x121] sm:$0xff] }
  0x5f   : > { %v282_v39 = vld [vmem:[#allocation2 + $0x110] sm:$0xff]  ;;  %v432_v54 = vadd.f32 %v394_v31, %v318_v30  ;;  %v622_v43 = vmul.f32 0.125, %v584_v21  ;;  %v319_v44 = vmul.f32 0.125, %v281_v25  ;;  %v395_v45 = vmul.f32 0.375, %v357_v27  ;;  %685 = vst.msk [vmem:[#allocation3 + $0x40] sm:$0xff] %vm148_vm0, %v1393_v32  ;;  %v473_v53 = vld [vmem:[#allocation2 + $0x122] sm:$0xff] }
  0x60   : > { %v358_v41 = vld [vmem:[#allocation2 + $0x111] sm:$0xff]  ;;  %v1448_v62 = vadd.f32 %v620_v18, %v544_v35  ;;  %v545_v49 = vadd.f32 %v507_v16, %v431_v36  ;;  %v509_v50 = vmul.f32 0.375, %v471_v28  ;;  %v623_v51 = vmul.f32 0.125, %v585_v34  ;;  %686 = vst.msk [vmem:[#allocation3 + $0x48] sm:$0xff] %vm148_vm0, %v1397_v40  ;;  %v587_v60 = vld [vmem:[#allocation2 + $0x123] sm:$0xff]  ;;  %v361_v11 = vld [vmem:[#allocation2 + $0x139] sm:$0xff] }
  0x61   : > { %v472_v42 = vld [vmem:[#allocation2 + $0x112] sm:$0xff]  ;;  %v546_v14 = vadd.f32 %v508_v37, %v432_v54  ;;  %v433_v56 = vadd.f32 %v395_v45, %v319_v44  ;;  %v320_v58 = vmul.f32 0.125, %v282_v39  ;;  %v396_v59 = vmul.f32 0.375, %v358_v41  ;;  %v284_v61 = vld [vmem:[#allocation2 + $0x128] sm:$0xff]  ;;  %687 = vst.msk [vmem:[#allocation3 + $0x50] sm:$0xff] %vm148_vm0, %v1403_v55  ;;  %v475_v12 = vld [vmem:[#allocation2 + $0x13a] sm:$0xff] }
  0x62   : > { %v360_v63 = vld [vmem:[#allocation2 + $0x129] sm:$0xff]  ;;  %v1454_v32 = vadd.f32 %v621_v29, %v545_v49  ;;  %v510_v2 = vmul.f32 0.375, %v472_v42  ;;  %v624_v3 = vmul.f32 0.125, %v586_v46  ;;  %v321_v4 = vmul.f32 0.125, %v283_v48  ;;  %688 = vst.msk [vmem:[#allocation3 + $0x58] sm:$0xff] %vm148_vm0, %v1409_v9  ;;  %v285_v10 = vld [vmem:[#allocation2 + $0x138] sm:$0xff] }
  0x63   : > { %v474_v5 = vld [vmem:[#allocation2 + $0x12a] sm:$0xff]  ;;  %v1458_v40 = vadd.f32 %v622_v43, %v546_v14  ;;  %v547_v57 = vadd.f32 %v509_v50, %v433_v56  ;;  %v434_v7 = vadd.f32 %v396_v59, %v320_v58  ;;  %v397_v8 = vmul.f32 0.375, %v359_v52  ;;  %689 = vst.msk [vmem:[#allocation3 + $0x60] sm:$0xff] %vm148_vm0, %v1413_v26  ;;  %v589_v19 = vld [vmem:[#allocation2 + $0x13b] sm:$0xff]  ;;  %v477_v37 = vld [vmem:[#allocation2 + $0x152] sm:$0xff] }
  0x64   : > { %v588_v6 = vld [vmem:[#allocation2 + $0x12b] sm:$0xff]  ;;  %v511_v55 = vmul.f32 0.375, %v473_v53  ;;  %v625_v13 = vmul.f32 0.125, %v587_v60  ;;  %v322_v17 = vmul.f32 0.125, %v284_v61  ;;  %v398_v18 = vmul.f32 0.375, %v360_v63  ;;  %690 = vst.msk [vmem:[#allocation3 + $0x68] sm:$0xff] %vm148_vm0, %v1416_v33 }
  0x65   : > { %v1464_v9 = vadd.f32 %v623_v51, %v547_v57  ;;  %v548_v20 = vadd.f32 %v510_v2, %v434_v7  ;;  %v435_v21 = vadd.f32 %v397_v8, %v321_v4  ;;  %v512_v22 = vmul.f32 0.375, %v474_v5  ;;  %v286_v23 = vld [vmem:[#allocation2 + $0x140] sm:$0xff]  ;;  %691 = vst.msk [vmem:[#allocation3 + $0x70] sm:$0xff] %vm148_vm0, %v1420_v47  ;;  %v287_v30 = vld [vmem:[#allocation2 + $0x150] sm:$0xff]  ;;  %v288_v43 = vld [vmem:[#allocation2 + $0x158] sm:$0xff] }
  0x66   : > { %v362_v24 = vld [vmem:[#allocation2 + $0x141] sm:$0xff]  ;;  %v436_v26 = vadd.f32 %v398_v18, %v322_v17  ;;  %v626_v27 = vmul.f32 0.125, %v588_v6  ;;  %v323_v28 = vmul.f32 0.125, %v285_v10  ;;  %v399_v16 = vmul.f32 0.375, %v361_v11  ;;  %692 = vst.msk [vmem:[#allocation3 + $0x78] sm:$0xff] %vm148_vm0, %v1426_v1  ;;  %v363_v36 = vld [vmem:[#allocation2 + $0x151] sm:$0xff] }
  0x67   : > { %v476_v25 = vld [vmem:[#allocation2 + $0x142] sm:$0xff]  ;;  %v662_v33 = vadd.f32 %v624_v3, %v548_v20  ;;  %v549_v31 = vadd.f32 %v511_v55, %v435_v21  ;;  %v513_v34 = vmul.f32 0.375, %v475_v12  ;;  %v627_v35 = vmul.f32 0.125, %v589_v19  ;;  %693 = vst.msk [vmem:[#allocation3 + $0x80] sm:$0xff] %vm148_vm0, %v1432_v0  ;;  %v591_v54 = vld [vmem:[#allocation2 + $0x153] sm:$0xff]  ;;  %v479_v58 = vld [vmem:[#allocation2 + $0x16a] sm:$0xff] }
  0x68   : > { %v590_v29 = vld [vmem:[#allocation2 + $0x143] sm:$0xff]  ;;  %v550_v39 = vadd.f32 %v512_v22, %v436_v26  ;;  %v437_v47 = vadd.f32 %v399_v16, %v323_v28  ;;  %v324_v41 = vmul.f32 0.125, %v286_v23  ;;  %v400_v42 = vmul.f32 0.375, %v362_v24  ;;  %v364_v44 = vld [vmem:[#allocation2 + $0x159] sm:$0xff]  ;;  %694 = vst.msk [vmem:[#allocation3 + $0x88] sm:$0xff] %vm148_vm0, %v1436_v15  ;;  %v593_v63 = vld [vmem:[#allocation2 + $0x16b] sm:$0xff] }
  0x69   : > { %v663_v1 = vadd.f32 %v625_v13, %v549_v31  ;;  %v514_v45 = vmul.f32 0.375, %v476_v25  ;;  %v628_v46 = vmul.f32 0.125, %v590_v29  ;;  %v325_v48 = vmul.f32 0.125, %v287_v30  ;;  %v478_v49 = vld [vmem:[#allocation2 + $0x15a] sm:$0xff]  ;;  %695 = vst.msk [vmem:[#allocation3 + $0x90] sm:$0xff] %vm148_vm0, %v1442_v38  ;;  %v289_v14 = vld [vmem:[#allocation2 + $0x168] sm:$0xff] }
  0x6a   : > { %v592_v50 = vld [vmem:[#allocation2 + $0x15b] sm:$0xff]  ;;  %v664_v0 = vadd.f32 %v626_v27, %v550_v39  ;;  %v551_v51 = vadd.f32 %v513_v34, %v437_v47  ;;  %v438_v52 = vadd.f32 %v400_v42, %v324_v41  ;;  %v401_v53 = vmul.f32 0.375, %v363_v36  ;;  %v365_v56 = vld [vmem:[#allocation2 + $0x169] sm:$0xff]  ;;  %696 = vst.msk [vmem:[#allocation3 + $0x98] sm:$0xff] %vm148_vm0, %v1448_v62  ;;  %v366_v6 = vld [vmem:[#allocation2 + $0x171] sm:$0xff] }
  0x6b   : > { %v515_v15 = vmul.f32 0.375, %v477_v37  ;;  %v629_v59 = vmul.f32 0.125, %v591_v54  ;;  %v326_v60 = vmul.f32 0.125, %v288_v43  ;;  %v402_v61 = vmul.f32 0.375, %v364_v44  ;;  %697 = vst.msk [vmem:[#allocation3 + $0xa0] sm:$0xff] %vm148_vm0, %v1454_v32  ;;  %v290_v5 = vld [vmem:[#allocation2 + $0x170] sm:$0xff] }
  0x6c   : > { %v665_v2 = vadd.f32 %v627_v35, %v551_v51  ;;  %v552_v38 = vadd.f32 %v514_v45, %v438_v52  ;;  %v439_v3 = vadd.f32 %v401_v53, %v325_v48  ;;  %v516_v4 = vmul.f32 0.375, %v478_v49  ;;  %v480_v57 = vld [vmem:[#allocation2 + $0x172] sm:$0xff]  ;;  %698 = vst.msk [vmem:[#allocation3 + $0xa8] sm:$0xff] %vm148_vm0, %v1458_v40  ;;  %v291_v12 = vld [vmem:[#allocation2 + $0x180] sm:$0xff]  ;;  %v292_v24 = vld [vmem:[#allocation2 + $0x188] sm:$0xff] }
  0x6d   : > { %v440_v7 = vadd.f32 %v402_v61, %v326_v60  ;;  %v630_v62 = vmul.f32 0.125, %v592_v50  ;;  %v327_v8 = vmul.f32 0.125, %v289_v14  ;;  %v403_v10 = vmul.f32 0.375, %v365_v56  ;;  %v594_v11 = vld [vmem:[#allocation2 + $0x173] sm:$0xff]  ;;  %699 = vst.msk [vmem:[#allocation3 + $0xb0] sm:$0xff] %vm148_vm0, %v1464_v9  ;;  %v367_v18 = vld [vmem:[#allocation2 + $0x181] sm:$0xff] }
  0x6e   : > { %v666_v32 = vadd.f32 %v628_v46, %v552_v38  ;;  %v553_v55 = vadd.f32 %v515_v15, %v439_v3  ;;  %v517_v13 = vmul.f32 0.375, %v479_v58  ;;  %v631_v17 = vmul.f32 0.125, %v593_v63  ;;  %v481_v19 = vld [vmem:[#allocation2 + $0x182] sm:$0xff]  ;;  %700 = vst.msk [vmem:[#allocation3 + $0xb8] sm:$0xff] %vm148_vm0, %v662_v33  ;;  %v482_v16 = vld [vmem:[#allocation2 + $0x18a] sm:$0xff]  ;;  %v293_v35 = vld [vmem:[#allocation2 + $0x198] sm:$0xff] }
  0x6f   : > { %v554_v20 = vadd.f32 %v516_v4, %v440_v7  ;;  %v441_v21 = vadd.f32 %v403_v10, %v327_v8  ;;  %v328_v40 = vmul.f32 0.125, %v290_v5  ;;  %v404_v22 = vmul.f32 0.375, %v366_v6  ;;  %v595_v23 = vld [vmem:[#allocation2 + $0x183] sm:$0xff]  ;;  %701 = vst.msk [vmem:[#allocation3 + $0xc0] sm:$0xff] %vm148_vm0, %v663_v1  ;;  %v596_v29 = vld [vmem:[#allocation2 + $0x18b] sm:$0xff]  ;;  %v369_v36 = vld [vmem:[#allocation2 + $0x199] sm:$0xff] }
  0x70   : > { %v368_v25 = vld [vmem:[#allocation2 + $0x189] sm:$0xff]  ;;  %v667_v26 = vadd.f32 %v629_v59, %v553_v55  ;;  %v518_v27 = vmul.f32 0.375, %v480_v57  ;;  %v632_v9 = vmul.f32 0.125, %v594_v11  ;;  %v329_v28 = vmul.f32 0.125, %v291_v12  ;;  %702 = vst.msk [vmem:[#allocation3 + $0xc8] sm:$0xff] %vm148_vm0, %v664_v0  ;;  %v483_v37 = vld [vmem:[#allocation2 + $0x19a] sm:$0xff] }
  0x71   : > { %v668_v30 = vadd.f32 %v630_v62, %v554_v20  ;;  %v555_v31 = vadd.f32 %v517_v13, %v441_v21  ;;  %v442_v33 = vadd.f32 %v404_v22, %v328_v40  ;;  %v405_v34 = vmul.f32 0.375, %v367_v18  ;;  %703 = vst.msk [vmem:[#allocation3 + $0xd0] sm:$0xff] %vm148_vm0, %v665_v2  ;;  %v597_v54 = vld [vmem:[#allocation2 + $0x19b] sm:$0xff]  ;;  %v598_v53 = vld [vmem:[#allocation2 + $0x1a3] sm:$0xff]  ;;  %v295_v14 = vld [vmem:[#allocation2 + $0x1b0] sm:$0xff] }
  0x72   : > { %v519_v39 = vmul.f32 0.375, %v481_v19  ;;  %v633_v47 = vmul.f32 0.125, %v595_v23  ;;  %v330_v41 = vmul.f32 0.125, %v292_v24  ;;  %v406_v42 = vmul.f32 0.375, %v368_v25  ;;  %704 = vst.msk [vmem:[#allocation3 + $0xd8] sm:$0xff] %vm148_vm0, %v666_v32  ;;  %v294_v46 = vld [vmem:[#allocation2 + $0x1a0] sm:$0xff] }
  0x73   : > { %v669_v43 = vadd.f32 %v631_v17, %v555_v31  ;;  %v556_v44 = vadd.f32 %v518_v27, %v442_v33  ;;  %v443_v1 = vadd.f32 %v405_v34, %v329_v28  ;;  %v520_v45 = vmul.f32 0.375, %v482_v16  ;;  %v370_v48 = vld [vmem:[#allocation2 + $0x1a1] sm:$0xff]  ;;  %705 = vst.msk [vmem:[#allocation3 + $0xe0] sm:$0xff] %vm148_vm0, %v667_v26  ;;  %v371_v60 = vld [vmem:[#allocation2 + $0x1b1] sm:$0xff]  ;;  %v372_v6 = vld [vmem:[#allocation2 + $0x1b9] sm:$0xff] }
  0x74   : > { %v484_v49 = vld [vmem:[#allocation2 + $0x1a2] sm:$0xff]  ;;  %v444_v50 = vadd.f32 %v406_v42, %v330_v41  ;;  %v634_v0 = vmul.f32 0.125, %v596_v29  ;;  %v331_v51 = vmul.f32 0.125, %v293_v35  ;;  %v407_v52 = vmul.f32 0.375, %v369_v36  ;;  %706 = vst.msk [vmem:[#allocation3 + $0xe8] sm:$0xff] %vm148_vm0, %v668_v30  ;;  %v485_v61 = vld [vmem:[#allocation2 + $0x1b2] sm:$0xff] }
  0x75   : > { %v670_v56 = vadd.f32 %v632_v9, %v556_v44  ;;  %v557_v58 = vadd.f32 %v519_v39, %v443_v1  ;;  %v521_v15 = vmul.f32 0.375, %v483_v37  ;;  %v635_v59 = vmul.f32 0.125, %v597_v54  ;;  %707 = vst.msk [vmem:[#allocation3 + $0xf0] sm:$0xff] %vm148_vm0, %v669_v43  ;;  %v599_v4 = vld [vmem:[#allocation2 + $0x1b3] sm:$0xff]  ;;  %v600_v13 = vld [vmem:[#allocation2 + $0x1bb] sm:$0xff]  ;;  %v715_v17 = vld [vmem:[#allocation3] sm:$0xff] }
  0x76   : > { %v558_v63 = vadd.f32 %v520_v45, %v444_v50  ;;  %v445_v2 = vadd.f32 %v407_v52, %v331_v51  ;;  %v332_v38 = vmul.f32 0.125, %v294_v46  ;;  %v408_v3 = vmul.f32 0.375, %v370_v48  ;;  %v296_v5 = vld [vmem:[#allocation2 + $0x1b8] sm:$0xff]  ;;  %v877_v22 = vld [vmem:[#allocation3 + $0x20] sm:$0xff]  ;;  %v716_v27 = vld [vmem:[#allocation3 + $0x8] sm:$0xff] }
  0x77   : > { %708 = vst.msk [vmem:[#allocation3 + $0xf8] sm:$0xff] %vm148_vm0, %v670_v56  ;;  %v671_v57 = vadd.f32 %v633_v47, %v557_v58  ;;  %v522_v7 = vmul.f32 0.375, %v484_v49  ;;  %v636_v62 = vmul.f32 0.125, %v598_v53  ;;  %v333_v8 = vmul.f32 0.125, %v295_v14  ;;  %v486_v10 = vld [vmem:[#allocation2 + $0x1ba] sm:$0xff]  ;;  %v878_v33 = vld [vmem:[#allocation3 + $0x28] sm:$0xff] }
  0x78   : > { %v672_v11 = vadd.f32 %v634_v0, %v558_v63  ;;  %v559_v12 = vadd.f32 %v521_v15, %v445_v2  ;;  %v446_v32 = vadd.f32 %v408_v3, %v332_v38  ;;  %v409_v55 = vmul.f32 0.375, %v371_v60  ;;  %v780_v18 = vld [vmem:[#allocation3 + $0x10] sm:$0xff]  ;;  %v781_v9 = vld [vmem:[#allocation3 + $0x18] sm:$0xff]  ;;  %v976_v54 = vld [vmem:[#allocation3 + $0x40] sm:$0xff] }
  0x79   : > { %709 = vst.msk [vmem:[#allocation3 + $0x100] sm:$0xff] %vm148_vm0, %v671_v57  ;;  %v523_v19 = vmul.f32 0.375, %v485_v61  ;;  %v637_v20 = vmul.f32 0.125, %v599_v4  ;;  %v334_v21 = vmul.f32 0.125, %v296_v5  ;;  %v410_v40 = vmul.f32 0.375, %v372_v6  ;;  %v974_v31 = vld [vmem:[#allocation3 + $0x30] sm:$0xff] }
  0x7a   : > { %710 = vst.msk [vmem:[#allocation3 + $0x108] sm:$0xff] %vm148_vm0, %v672_v11  ;;  %v673_v23 = vadd.f32 %v635_v59, %v559_v12  ;;  %v560_v24 = vadd.f32 %v522_v7, %v446_v32  ;;  %v447_v25 = vadd.f32 %v409_v55, %v333_v8  ;;  %v524_v26 = vmul.f32 0.375, %v486_v10  ;;  %v975_v42 = vld [vmem:[#allocation3 + $0x38] sm:$0xff]  ;;  %v977_v0 = vld [vmem:[#allocation3 + $0x48] sm:$0xff]  ;;  %v978_v60 = vld [vmem:[#allocation3 + $0x50] sm:$0xff] }
  0x7b   : > { %v448_v28 = vadd.f32 %v410_v40, %v334_v21  ;;  %v638_v16 = vmul.f32 0.125, %v600_v13  ;;  %v747_v29 = vmul.f32 0.125, %v715_v17  ;;  %v812_v30 = vmul.f32 0.375, %v780_v18  ;;  %v979_v3 = vld [vmem:[#allocation3 + $0x58] sm:$0xff]  ;;  %v980_v7 = vld [vmem:[#allocation3 + $0x60] sm:$0xff]  ;;  %v981_v17 = vld [vmem:[#allocation3 + $0x68] sm:$0xff] }
  0x7c   : > { %711 = vst.msk [vmem:[#allocation3 + $0x110] sm:$0xff] %vm148_vm0, %v673_v23  ;;  %v674_v34 = vadd.f32 %v636_v62, %v560_v24  ;;  %v561_v35 = vadd.f32 %v523_v19, %v447_v25  ;;  %v909_v36 = vmul.f32 0.375, %v877_v22  ;;  %v748_v47 = vmul.f32 0.125, %v716_v27  ;;  %v982_v40 = vld [vmem:[#allocation3 + $0x70] sm:$0xff] }
  0x7d   : > { %v562_v37 = vadd.f32 %v524_v26, %v448_v28  ;;  %v844_v39 = vadd.f32 %v812_v30, %v747_v29  ;;  %v813_v41 = vmul.f32 0.375, %v781_v9  ;;  %v1006_v44 = vmul.f32 0.125, %v974_v31 }
  0x7e   : > { %712 = vst.msk [vmem:[#allocation3 + $0x118] sm:$0xff] %vm148_vm0, %v674_v34  ;;  %v675_v43 = vadd.f32 %v637_v20, %v561_v35  ;;  %v910_v1 = vmul.f32 0.375, %v878_v33  ;;  %v749_v45 = vmul.f32 0.125, %v780_v18  ;;  %v911_v50 = vmul.f32 0.375, %v974_v31  ;;  %v984_v34 = vld [vmem:[#allocation3 + $0x80] sm:$0xff] }
  0x7f   : > { %v676_v46 = vadd.f32 %v638_v16, %v562_v37  ;;  %v941_v48 = vadd.f32 %v909_v36, %v844_v39  ;;  %v845_v49 = vadd.f32 %v813_v41, %v748_v47  ;;  %v1007_v51 = vmul.f32 0.125, %v975_v42  ;;  %v983_v16 = vld [vmem:[#allocation3 + $0x78] sm:$0xff]  ;;  %v985_v47 = vld [vmem:[#allocation3 + $0x88] sm:$0xff] }
  0x80   : > { %713 = vst.msk [vmem:[#allocation3 + $0x120] sm:$0xff] %vm148_vm0, %v675_v43  ;;  %v846_v52 = vadd.f32 %v909_v36, %v749_v45  ;;  %v1008_v53 = vmul.f32 0.125, %v976_v54  ;;  %v750_v14 = vmul.f32 0.125, %v781_v9  ;;  %v912_v15 = vmul.f32 0.375, %v975_v42 }
  0x81   : > { %714 = vst.msk [vmem:[#allocation3 + $0x128] sm:$0xff] %vm148_vm0, %v676_v46  ;;  %v1038_v56 = vadd.f32 %v1006_v44, %v941_v48  ;;  %v942_v58 = vadd.f32 %v910_v1, %v845_v49  ;;  %v751_v59 = vmul.f32 0.125, %v877_v22  ;;  %v1009_v2 = vmul.f32 0.125, %v977_v0 }
  0x82   : > { %v943_v61 = vadd.f32 %v911_v50, %v846_v52  ;;  %v847_v63 = vadd.f32 %v910_v1, %v750_v14  ;;  %v913_v38 = vmul.f32 0.375, %v976_v54  ;;  %v752_v6 = vmul.f32 0.125, %v878_v33  ;;  %v987_v52 = vld [vmem:[#allocation3 + $0x98] sm:$0xff] }
  0x83   : > { %1070 = vst.msk [vmem:[%s1503_s16] sm:$0xff] %vm148_vm0, %v1038_v56  ;;  %v1039_v4 = vadd.f32 %v1007_v51, %v942_v58  ;;  %v848_v5 = vadd.f32 %v911_v50, %v751_v59  ;;  %v914_v57 = vmul.f32 0.375, %v977_v0  ;;  %v1010_v10 = vmul.f32 0.125, %v978_v60 }
  0x84   : > { %v1040_v62 = vadd.f32 %v1008_v53, %v943_v61  ;;  %v944_v8 = vadd.f32 %v912_v15, %v847_v63  ;;  %v850_v11 = vadd.f32 %v1006_v44, %v913_v38  ;;  %v849_v32 = vadd.f32 %v912_v15, %v752_v6  ;;  %v986_v44 = vld [vmem:[#allocation3 + $0x90] sm:$0xff]  ;;  %v988_v15 = vld [vmem:[#allocation3 + $0xa0] sm:$0xff] }
  0x85   : > { %1071 = vst.msk [vmem:[%s1503_s16 + $0x8] sm:$0xff] %vm148_vm0, %v1039_v4  ;;  %v945_v12 = vadd.f32 %v913_v38, %v848_v5  ;;  %v1011_v55 = vmul.f32 0.125, %v979_v3  ;;  %v915_v13 = vmul.f32 0.375, %v978_v60  ;;  %v1012_v19 = vmul.f32 0.125, %v980_v7  ;;  %v990_v6 = vld [vmem:[#allocation3 + $0xb0] sm:$0xff] }
  0x86   : > { %1072 = vst.msk [vmem:[%s1503_s16 + $0x10] sm:$0xff] %vm148_vm0, %v1040_v62  ;;  %v1041_v18 = vadd.f32 %v1009_v2, %v944_v8  ;;  %v851_v20 = vadd.f32 %v1007_v51, %v914_v57  ;;  %v916_v21 = vmul.f32 0.375, %v979_v3  ;;  %v946_v23 = vadd.f32 %v914_v57, %v849_v32 }
  0x87   : > { %v1042_v22 = vadd.f32 %v1010_v10, %v945_v12  ;;  %v947_v24 = vadd.f32 %v915_v13, %v850_v11  ;;  %v852_v25 = vadd.f32 %v1008_v53, %v915_v13  ;;  %v1013_v27 = vmul.f32 0.125, %v981_v17 }
  0x88   : > { %1073 = vst.msk [vmem:[%s1503_s16 + $0x18] sm:$0xff] %vm148_vm0, %v1041_v18  ;;  %v948_v26 = vadd.f32 %v916_v21, %v851_v20  ;;  %v917_v9 = vmul.f32 0.375, %v980_v7  ;;  %v853_v28 = vadd.f32 %v1009_v2, %v916_v21  ;;  %v1043_v29 = vadd.f32 %v1011_v55, %v946_v23  ;;  %v989_v2 = vld [vmem:[#allocation3 + $0xa8] sm:$0xff]  ;;  %v992_v20 = vld [vmem:[#allocation3 + $0xc0] sm:$0xff] }
  0x89   : > { %1074 = vst.msk [vmem:[%s1503_s16 + $0x20] sm:$0xff] %vm148_vm0, %v1042_v22  ;;  %v1044_v30 = vadd.f32 %v1012_v19, %v947_v24  ;;  %v1014_v31 = vmul.f32 0.125, %v982_v40  ;;  %v918_v33 = vmul.f32 0.375, %v981_v17  ;;  %v919_v39 = vmul.f32 0.375, %v982_v40  ;;  %v993_v24 = vld [vmem:[#allocation3 + $0xc8] sm:$0xff] }
  0x8a   : > { %v1045_v35 = vadd.f32 %v1013_v27, %v948_v26  ;;  %v949_v36 = vadd.f32 %v917_v9, %v852_v25  ;;  %v854_v37 = vadd.f32 %v1010_v10, %v917_v9  ;;  %1075 = vst.msk [vmem:[%s1503_s16 + $0x28] sm:$0xff] %vm148_vm0, %v1043_v29  ;;  %v1015_v42 = vmul.f32 0.125, %v983_v16 }
  0x8b   : > { %v950_v41 = vadd.f32 %v918_v33, %v853_v28  ;;  %v855_v54 = vadd.f32 %v1011_v55, %v918_v33  ;;  %v920_v43 = vmul.f32 0.375, %v983_v16  ;;  %1076 = vst.msk [vmem:[%s1503_s16 + $0x30] sm:$0xff] %vm148_vm0, %v1044_v30  ;;  %v1016_v46 = vmul.f32 0.125, %v984_v34  ;;  %v991_v55 = vld [vmem:[#allocation3 + $0xb8] sm:$0xff]  ;;  %v994_v28 = vld [vmem:[#allocation3 + $0xd0] sm:$0xff] }
  0x8c   : > { %v1046_v1 = vadd.f32 %v1014_v31, %v949_v36  ;;  %v951_v45 = vadd.f32 %v919_v39, %v854_v37  ;;  %v856_v48 = vadd.f32 %v1012_v19, %v919_v39  ;;  %1077 = vst.msk [vmem:[%s1503_s16 + $0x38] sm:$0xff] %vm148_vm0, %v1045_v35  ;;  %v1017_v0 = vmul.f32 0.125, %v985_v47  ;;  %v995_v37 = vld [vmem:[#allocation3 + $0xd8] sm:$0xff] }
  0x8d   : > { %v1047_v49 = vadd.f32 %v1015_v42, %v950_v41  ;;  %v952_v50 = vadd.f32 %v920_v43, %v855_v54  ;;  %v921_v51 = vmul.f32 0.375, %v984_v34  ;;  %v1018_v14 = vmul.f32 0.125, %v986_v44  ;;  %v996_v54 = vld [vmem:[#allocation3 + $0xe0] sm:$0xff] }
  0x8e   : > { %1078 = vst.msk [vmem:[%s1503_s16 + $0x40] sm:$0xff] %vm148_vm0, %v1046_v1  ;;  %v1048_v53 = vadd.f32 %v1016_v46, %v951_v45  ;;  %v857_v56 = vadd.f32 %v1013_v27, %v920_v43  ;;  %v922_v58 = vmul.f32 0.375, %v985_v47  ;;  %v923_v63 = vmul.f32 0.375, %v986_v44 }
  0x8f   : > { %1079 = vst.msk [vmem:[%s1503_s16 + $0x48] sm:$0xff] %vm148_vm0, %v1047_v49  ;;  %v1049_v59 = vadd.f32 %v1017_v0, %v952_v50  ;;  %v953_v60 = vadd.f32 %v921_v51, %v856_v48  ;;  %v858_v61 = vadd.f32 %v1014_v31, %v921_v51  ;;  %v1019_v3 = vmul.f32 0.125, %v987_v52  ;;  %v998_v51 = vld [vmem:[#allocation3 + $0xf0] sm:$0xff] }
  0x90   : > { %1080 = vst.msk [vmem:[%s1503_s16 + $0x50] sm:$0xff] %vm148_vm0, %v1048_v53  ;;  %v954_v38 = vadd.f32 %v922_v58, %v857_v56  ;;  %v859_v4 = vadd.f32 %v1015_v42, %v922_v58  ;;  %v924_v5 = vmul.f32 0.375, %v987_v52  ;;  %v1020_v62 = vmul.f32 0.125, %v988_v15 }
  0x91   : > { %1081 = vst.msk [vmem:[%s1503_s16 + $0x58] sm:$0xff] %vm148_vm0, %v1049_v59  ;;  %v1050_v57 = vadd.f32 %v1018_v14, %v953_v60  ;;  %v955_v7 = vadd.f32 %v923_v63, %v858_v61  ;;  %v860_v8 = vadd.f32 %v1016_v46, %v923_v63  ;;  %v1021_v12 = vmul.f32 0.125, %v989_v2  ;;  %v997_v46 = vld [vmem:[#allocation3 + $0xe8] sm:$0xff]  ;;  %v999_v61 = vld [vmem:[#allocation3 + $0xf8] sm:$0xff] }
  0x92   : > { %v1051_v10 = vadd.f32 %v1019_v3, %v954_v38  ;;  %v956_v11 = vadd.f32 %v924_v5, %v859_v4  ;;  %v925_v32 = vmul.f32 0.375, %v988_v15  ;;  %v1022_v17 = vmul.f32 0.125, %v990_v6  ;;  %v1000_v4 = vld [vmem:[#allocation3 + $0x100] sm:$0xff] }
  0x93   : > { %1082 = vst.msk [vmem:[%s1503_s16 + $0x60] sm:$0xff] %vm148_vm0, %v1050_v57  ;;  %v1052_v13 = vadd.f32 %v1020_v62, %v955_v7  ;;  %v861_v18 = vadd.f32 %v1017_v0, %v924_v5  ;;  %v926_v19 = vmul.f32 0.375, %v989_v2  ;;  %v927_v23 = vmul.f32 0.375, %v990_v6 }
  0x94   : > { %1083 = vst.msk [vmem:[%s1503_s16 + $0x68] sm:$0xff] %vm148_vm0, %v1051_v10  ;;  %v1053_v21 = vadd.f32 %v1021_v12, %v956_v11  ;;  %v957_v40 = vadd.f32 %v925_v32, %v860_v8  ;;  %v862_v22 = vadd.f32 %v1018_v14, %v925_v32  ;;  %v1023_v26 = vmul.f32 0.125, %v991_v55  ;;  %v1002_v32 = vld [vmem:[#allocation3 + $0x110] sm:$0xff] }
  0x95   : > { %1084 = vst.msk [vmem:[%s1503_s16 + $0x70] sm:$0xff] %vm148_vm0, %v1052_v13  ;;  %v958_v25 = vadd.f32 %v926_v19, %v861_v18  ;;  %v863_v27 = vadd.f32 %v1019_v3, %v926_v19  ;;  %v928_v9 = vmul.f32 0.375, %v991_v55  ;;  %v1024_v30 = vmul.f32 0.125, %v992_v20 }
  0x96   : > { %1085 = vst.msk [vmem:[%s1503_s16 + $0x78] sm:$0xff] %vm148_vm0, %v1053_v21  ;;  %v1054_v16 = vadd.f32 %v1022_v17, %v957_v40  ;;  %v959_v29 = vadd.f32 %v927_v23, %v862_v22  ;;  %v864_v31 = vadd.f32 %v1020_v62, %v927_v23  ;;  %v1025_v35 = vmul.f32 0.125, %v993_v24  ;;  %v1001_v62 = vld [vmem:[#allocation3 + $0x108] sm:$0xff]  ;;  %v1003_v22 = vld [vmem:[#allocation3 + $0x118] sm:$0xff] }
  0x97   : > { %v1055_v33 = vadd.f32 %v1023_v26, %v958_v25  ;;  %v960_v34 = vadd.f32 %v928_v9, %v863_v27  ;;  %v929_v36 = vmul.f32 0.375, %v992_v20  ;;  %v1026_v47 = vmul.f32 0.125, %v994_v28  ;;  %v1004_v27 = vld [vmem:[#allocation3 + $0x120] sm:$0xff] }
  0x98   : > { %1086 = vst.msk [vmem:[%s1503_s16 + $0x80] sm:$0xff] %vm148_vm0, %v1054_v16  ;;  %v1056_v39 = vadd.f32 %v1024_v30, %v959_v29  ;;  %v865_v41 = vadd.f32 %v1021_v12, %v928_v9  ;;  %v930_v42 = vmul.f32 0.375, %v993_v24  ;;  %v931_v45 = vmul.f32 0.375, %v994_v28 }
  0x99   : > { %1087 = vst.msk [vmem:[%s1503_s16 + $0x88] sm:$0xff] %vm148_vm0, %v1055_v33  ;;  %v1057_v43 = vadd.f32 %v1025_v35, %v960_v34  ;;  %v961_v44 = vadd.f32 %v929_v36, %v864_v31  ;;  %v866_v1 = vadd.f32 %v1022_v17, %v929_v36  ;;  %v1027_v49 = vmul.f32 0.125, %v995_v37 }
  0x9a   : > { %1088 = vst.msk [vmem:[%s1503_s16 + $0x90] sm:$0xff] %vm148_vm0, %v1056_v39  ;;  %v962_v48 = vadd.f32 %v930_v42, %v865_v41  ;;  %v867_v50 = vadd.f32 %v1023_v26, %v930_v42  ;;  %v932_v0 = vmul.f32 0.375, %v995_v37  ;;  %v1028_v14 = vmul.f32 0.125, %v996_v54 }
  0x9b   : > { %1089 = vst.msk [vmem:[%s1503_s16 + $0x98] sm:$0xff] %vm148_vm0, %v1057_v43  ;;  %v1058_v52 = vadd.f32 %v1026_v47, %v961_v44  ;;  %v963_v53 = vadd.f32 %v931_v45, %v866_v1  ;;  %v868_v56 = vadd.f32 %v1024_v30, %v931_v45  ;;  %v1029_v59 = vmul.f32 0.125, %v997_v46  ;;  %v1005_v30 = vld [vmem:[#allocation3 + $0x128] sm:$0xff] }
  0x9c   : > { %v1059_v58 = vadd.f32 %v1027_v49, %v962_v48  ;;  %v964_v15 = vadd.f32 %v932_v0, %v867_v50  ;;  %v933_v60 = vmul.f32 0.375, %v996_v54  ;;  %v1030_v2 = vmul.f32 0.125, %v998_v51 }
  0x9d   : > { %1090 = vst.msk [vmem:[%s1503_s16 + $0xa0] sm:$0xff] %vm148_vm0, %v1058_v52  ;;  %v1060_v63 = vadd.f32 %v1028_v14, %v963_v53  ;;  %v869_v38 = vadd.f32 %v1025_v35, %v932_v0  ;;  %v934_v3 = vmul.f32 0.375, %v997_v46  ;;  %v935_v7 = vmul.f32 0.375, %v998_v51 }
  0x9e   : > { %1091 = vst.msk [vmem:[%s1503_s16 + $0xa8] sm:$0xff] %vm148_vm0, %v1059_v58  ;;  %v1061_v5 = vadd.f32 %v1029_v59, %v964_v15  ;;  %v965_v6 = vadd.f32 %v933_v60, %v868_v56  ;;  %v870_v57 = vadd.f32 %v1026_v47, %v933_v60  ;;  %v1031_v10 = vmul.f32 0.125, %v999_v61 }
  0x9f   : > { %1092 = vst.msk [vmem:[%s1503_s16 + $0xb0] sm:$0xff] %vm148_vm0, %v1060_v63  ;;  %v966_v8 = vadd.f32 %v934_v3, %v869_v38  ;;  %v871_v11 = vadd.f32 %v1027_v49, %v934_v3  ;;  %v936_v12 = vmul.f32 0.375, %v999_v61  ;;  %v1032_v17 = vmul.f32 0.125, %v1000_v4 }
  0xa0   : > { %1093 = vst.msk [vmem:[%s1503_s16 + $0xb8] sm:$0xff] %vm148_vm0, %v1061_v5  ;;  %v1062_v55 = vadd.f32 %v1030_v2, %v965_v6  ;;  %v967_v13 = vadd.f32 %v935_v7, %v870_v57  ;;  %v872_v18 = vadd.f32 %v1028_v14, %v935_v7  ;;  %v1033_v21 = vmul.f32 0.125, %v1001_v62 }
  0xa1   : > { %v1063_v19 = vadd.f32 %v1031_v10, %v966_v8  ;;  %v968_v20 = vadd.f32 %v936_v12, %v871_v11  ;;  %v937_v40 = vmul.f32 0.375, %v1000_v4  ;;  %v1034_v24 = vmul.f32 0.125, %v1002_v32 }
  0xa2   : > { %1094 = vst.msk [vmem:[%s1503_s16 + $0xc0] sm:$0xff] %vm148_vm0, %v1062_v55  ;;  %v1064_v23 = vadd.f32 %v1032_v17, %v967_v13  ;;  %v873_v25 = vadd.f32 %v1029_v59, %v936_v12  ;;  %v938_v26 = vmul.f32 0.375, %v1001_v62  ;;  %v939_v29 = vmul.f32 0.375, %v1002_v32 }
  0xa3   : > { %1095 = vst.msk [vmem:[%s1503_s16 + $0xc8] sm:$0xff] %vm148_vm0, %v1063_v19  ;;  %v1065_v9 = vadd.f32 %v1033_v21, %v968_v20  ;;  %v969_v28 = vadd.f32 %v937_v40, %v872_v18  ;;  %v874_v16 = vadd.f32 %v1030_v2, %v937_v40  ;;  %v1035_v33 = vmul.f32 0.125, %v1003_v22 }
  0xa4   : > { %1096 = vst.msk [vmem:[%s1503_s16 + $0xd0] sm:$0xff] %vm148_vm0, %v1064_v23  ;;  %v970_v31 = vadd.f32 %v938_v26, %v873_v25  ;;  %v875_v34 = vadd.f32 %v1031_v10, %v938_v26  ;;  %v940_v35 = vmul.f32 0.375, %v1003_v22  ;;  %v1036_v39 = vmul.f32 0.125, %v1004_v27 }
  0xa5   : > { %1097 = vst.msk [vmem:[%s1503_s16 + $0xd8] sm:$0xff] %vm148_vm0, %v1065_v9  ;;  %v1066_v36 = vadd.f32 %v1034_v24, %v969_v28  ;;  %v971_v37 = vadd.f32 %v939_v29, %v874_v16  ;;  %v1037_v42 = vmul.f32 0.125, %v1005_v30 }
  0xa6   : > { %v1067_v47 = vadd.f32 %v1035_v33, %v970_v31  ;;  %v972_v41 = vadd.f32 %v940_v35, %v875_v34 }
  0xa7   : > { %1098 = vst.msk [vmem:[%s1503_s16 + $0xe0] sm:$0xff] %vm148_vm0, %v1066_v36  ;;  %v1068_v54 = vadd.f32 %v1036_v39, %v971_v37 }
  0xa8   : > { %1099 = vst.msk [vmem:[%s1503_s16 + $0xe8] sm:$0xff] %vm148_vm0, %v1067_v47  ;;  %v1069_v43 = vadd.f32 %v1037_v42, %v972_v41 }
  0xa9   : > { %1100 = vst.msk [vmem:[%s1503_s16 + $0xf0] sm:$0xff] %vm148_vm0, %v1068_v54 }
  0xaa   : > { %1101 = vst.msk [vmem:[%s1503_s16 + $0xf8] sm:$0xff] %vm148_vm0, %v1069_v43 }
  0xab PF: > { %s11_s8 = sadd.s32 1, %s1245_s8   ;;  %s1581_s6 = smov %s1241_s7 }
  0xac   : > { %p8_p5 = scmp.ge.s32.totalorder %s11_s8, 4   ;;  %s1582_s7 = smov %s1584_s9 }
  0xae   :  { %10 = sbr.rel (!%p8_p5) target bundleno = 2 (0x2), region = 59 }

</bundles_post_ra>
